<compile_context>
chip_gen: v7x
topology: tpu7x:2x2x1
jax: 0.10.0
libtpu: 0.0.40
codegen_flags: <defaults>
</compile_context>

<pallas_src>
import math
from functools import partial

import jax
import jax.numpy as jnp
from jax.experimental import pallas as pl
from jax.experimental.pallas import tpu as pltpu

LANE = 128
COMPUTE_DTYPE = jnp.bfloat16  # MXU dtype; accumulation is always f32.


# ----------------------------------------------------------------------------
# Small helpers
# ----------------------------------------------------------------------------
def round_up(x, m):
    return (x + m - 1) // m * m


def _pick_tile(dim, target, align):
    """Largest tile <= target that divides `dim` and is a multiple of `align`
    (falls back to the full dim, which is always a legal block)."""
    if dim <= target:
        return dim
    t = (target // align) * align
    while t >= align:
        if dim % t == 0:
            return t
        t -= align
    return dim


def _largest_divisor_leq(n, target):
    for t in range(min(n, target), 0, -1):
        if n % t == 0:
            return t
    return 1


# ----------------------------------------------------------------------------
# Tiled matmul kernels (used for the hoisted input projection and the decoder)
# ----------------------------------------------------------------------------
def _matmul_kernel(x_ref, w_ref, o_ref):
    o_ref[...] = jnp.dot(
        x_ref[...], w_ref[...], preferred_element_type=jnp.float32
    ).astype(o_ref.dtype)


def _matmul_bias_kernel(x_ref, w_ref, b_ref, o_ref):
    acc = jnp.dot(x_ref[...], w_ref[...], preferred_element_type=jnp.float32)
    o_ref[...] = (acc + b_ref[...]).astype(o_ref.dtype)


def tiled_matmul(x, w, bias=None, out_dtype=jnp.float32,
                 bm_target=256, bn_target=1024):
    """x: (N, K), w: (K, M), optional bias (M,) in f32.  K fits in one block
    (K is the padded feature dim, <= ~1.2k at paper scale)."""
    N, K = x.shape
    K2, M = w.shape
    assert K == K2
    bm = _pick_tile(N, bm_target, 8)
    bn = _pick_tile(M, bn_target, LANE)
    grid = (N // bm, M // bn)

    x_spec = pl.BlockSpec((bm, K), lambda i, j: (i, 0))
    w_spec = pl.BlockSpec((K, bn), lambda i, j: (0, j))
    o_spec = pl.BlockSpec((bm, bn), lambda i, j: (i, j))
    cp = pltpu.CompilerParams(dimension_semantics=("parallel", "parallel"))

    if bias is None:
        return pl.pallas_call(
            _matmul_kernel,
            out_shape=jax.ShapeDtypeStruct((N, M), out_dtype),
            grid_spec=pltpu.PrefetchScalarGridSpec(
                num_scalar_prefetch=0, grid=grid,
                in_specs=[x_spec, w_spec], out_specs=o_spec),
            compiler_params=cp,
        )(x, w)

    b_spec = pl.BlockSpec((1, bn), lambda i, j: (0, j))
    return pl.pallas_call(
        _matmul_bias_kernel,
        out_shape=jax.ShapeDtypeStruct((N, M), out_dtype),
        grid_spec=pltpu.PrefetchScalarGridSpec(
            num_scalar_prefetch=0, grid=grid,
            in_specs=[x_spec, w_spec, b_spec], out_specs=o_spec),
        compiler_params=cp,
    )(x, w, bias.reshape(1, M).astype(jnp.float32))


# ----------------------------------------------------------------------------
# LSTM recurrence kernel: only the (B,H)@(H,4H) matmul is left on the serial path.
# One grid step = `tc` timesteps; h/c persist in VMEM scratch across grid steps.
# ----------------------------------------------------------------------------
def lstm_recurrent_kernel(gates_ref, whh_ref, y_ref, h_sc, c_sc, *, tc, hidden):
    @pl.when(pl.program_id(0) == 0)
    def _():
        h_sc[...] = jnp.zeros_like(h_sc)
        c_sc[...] = jnp.zeros_like(c_sc)

    H = hidden  # padded to a multiple of 128 -> all gate slices are lane-aligned

    # Trace-time unrolled chunk of timesteps (tc <= 16): gives the scheduler
    # visibility across steps and amortizes per-grid-step overhead.
    for i in range(tc):
        h = h_sc[...]
        c = c_sc[...]
        # precomputed x@W_ih + b (hoisted) + recurrent h@W_hh (bf16 MXU, f32 acc)
        g = gates_ref[i].astype(jnp.float32) + jnp.dot(
            h.astype(whh_ref.dtype), whh_ref[...],
            preferred_element_type=jnp.float32)
        i_g = jax.nn.sigmoid(g[:, 0 * H:1 * H])
        f_g = jax.nn.sigmoid(g[:, 1 * H:2 * H])
        g_g = jnp.tanh(g[:, 2 * H:3 * H])
        o_g = jax.nn.sigmoid(g[:, 3 * H:4 * H])
        c_new = f_g * c + i_g * g_g
        h_new = o_g * jnp.tanh(c_new)
        c_sc[...] = c_new
        h_sc[...] = h_new
        y_ref[i] = h_new.astype(y_ref.dtype)


def lstm_layer(x, w_ih_t, w_hh_t, bias, *, time_chunk=8):
    """x: (S, B, In_pad) in COMPUTE_DTYPE.
    w_ih_t: (In_pad, 4*H_pad), w_hh_t: (H_pad, 4*H_pad) in COMPUTE_DTYPE,
    bias: (4*H_pad,) f32 (= b_ih + b_hh, gate-padded).
    Returns y: (S, B, H_pad) in COMPUTE_DTYPE."""
    S, B, In = x.shape
    H = w_hh_t.shape[0]
    H4 = w_hh_t.shape[1]

    # 1) Hoisted input projection: one big (S*B, In) @ (In, 4H) matmul.
    gates = tiled_matmul(
        x.reshape(S * B, In), w_ih_t, bias=bias, out_dtype=x.dtype,
    ).reshape(S, B, H4)

    # 2) Serial recurrence over time chunks.
    tc = _largest_divisor_leq(S, time_chunk)
    # NOTE: at paper dims (H=1150->1152) consider pipeline_mode=pl.Buffered(1)
    # on the constant W_hh block and raising vmem_limit_bytes; unnecessary at
    # the small shapes exercised here.
    y = pl.pallas_call(
        partial(lstm_recurrent_kernel, tc=tc, hidden=H),
        out_shape=jax.ShapeDtypeStruct((S, B, H), x.dtype),
        grid_spec=pltpu.PrefetchScalarGridSpec(
            num_scalar_prefetch=0,
            grid=(S // tc,),
            in_specs=[
                pl.BlockSpec((tc, B, H4), lambda t: (t, 0, 0)),   # gate pre-acts
                pl.BlockSpec((H, H4), lambda t: (0, 0)),          # W_hh (resident)
            ],
            out_specs=pl.BlockSpec((tc, B, H), lambda t: (t, 0, 0)),
            scratch_shapes=[
                pltpu.VMEM((B, H), jnp.float32),   # h state (f32)
                pltpu.VMEM((B, H), jnp.float32),   # c state (f32)
            ],
        ),
        compiler_params=pltpu.CompilerParams(
            dimension_semantics=("arbitrary",),   # recurrent -> sequential
        ),
    )(gates, w_hh_t)
    return y


# ----------------------------------------------------------------------------
# Parameter construction (mirrors the PyTorch module's __init__) and padding
# ----------------------------------------------------------------------------
def make_params(key, vocab_size, embedding_dim, hidden_size, num_layers):
    keys = jax.random.split(key, 1 + 4 * num_layers)
    emb_weight = jax.random.uniform(
        keys[0], (vocab_size, embedding_dim), jnp.float32, minval=-0.1, maxval=0.1)

    lstm_layers = []
    for i in range(num_layers):
        in_size = embedding_dim if i == 0 else hidden_size
        hid = hidden_size if i != num_layers - 1 else embedding_dim
        bound = 1.0 / math.sqrt(hid)
        k = keys[1 + 4 * i: 1 + 4 * (i + 1)]
        w_ih = jax.random.uniform(k[0], (4 * hid, in_size), jnp.float32, -bound, bound)
        w_hh = jax.random.uniform(k[1], (4 * hid, hid), jnp.float32, -bound, bound)
        b_ih = jax.random.uniform(k[2], (4 * hid,), jnp.float32, -bound, bound)
        b_hh = jax.random.uniform(k[3], (4 * hid,), jnp.float32, -bound, bound)
        # forget-gate bias (second quarter in i,f,g,o ordering) initialized to 1
        b_ih = b_ih.at[hid:2 * hid].set(1.0)
        b_hh = b_hh.at[hid:2 * hid].set(1.0)
        lstm_layers.append(dict(w_ih=w_ih, w_hh=w_hh, b_ih=b_ih, b_hh=b_hh))

    # Tied decoder: weight = embedding weight (V, E), bias = 0 (dropped in the
    # kernel since it is identically zero).
    return dict(emb_weight=emb_weight, lstm_layers=lstm_layers)


def _pad_gate_matrix(w, h, h_pad, in_dim, in_pad):
    """PyTorch (4h, in) layout [i;f;g;o] -> (4*h_pad, in_pad), zero-padded per gate."""
    w4 = w.reshape(4, h, in_dim)
    w4 = jnp.pad(w4, ((0, 0), (0, h_pad - h), (0, in_pad - in_dim)))
    return w4.reshape(4 * h_pad, in_pad)


def _pad_gate_bias(b, h, h_pad):
    b4 = jnp.pad(b.reshape(4, h), ((0, 0), (0, h_pad - h)))
    return b4.reshape(4 * h_pad)


def prepare_params(params, compute_dtype=COMPUTE_DTYPE):
    """Pad to lane-aligned (multiple-of-128) feature dims, transpose to the
    kernel layout and cast weights to the MXU compute dtype."""
    emb = params["emb_weight"]                     # (V, E) f32
    V, E = emb.shape
    E_pad = round_up(E, LANE)
    V_pad = round_up(V, LANE)

    emb_padded = jnp.pad(emb, ((0, 0), (0, E_pad - E)))                # lookup table
    dec_w_t = jnp.pad(emb, ((0, V_pad - V), (0, E_pad - E))).T         # (E_pad, V_pad)
    dec_w_t = dec_w_t.astype(compute_dtype)

    layers = []
    in_dim, in_pad = E, E_pad
    for layer in params["lstm_layers"]:
        w_ih, w_hh = layer["w_ih"], layer["w_hh"]
        h = w_hh.shape[1]
        h_pad = round_up(h, LANE)
        w_ih_t = _pad_gate_matrix(w_ih, h, h_pad, in_dim, in_pad).T.astype(compute_dtype)
        w_hh_t = _pad_gate_matrix(w_hh, h, h_pad, h, h_pad).T.astype(compute_dtype)
        bias = _pad_gate_bias(layer["b_ih"] + layer["b_hh"], h, h_pad).astype(jnp.float32)
        layers.append(dict(w_ih_t=w_ih_t, w_hh_t=w_hh_t, bias=bias))
        in_dim, in_pad = h, h_pad

    return dict(emb_padded=emb_padded, dec_w_t=dec_w_t, lstm_layers=layers)


# ----------------------------------------------------------------------------
# Full model forward (eval mode, finetuning=False)
# ----------------------------------------------------------------------------
@partial(jax.jit, static_argnames=("vocab_size", "time_chunk"))
def reclm_forward(prepared, token_ids, *, vocab_size, time_chunk=8):
    compute_dtype = prepared["dec_w_t"].dtype
    # Embedding lookup (all dropouts are identity at eval) -- plain-JAX gather.
    emb = jnp.take(prepared["emb_padded"], token_ids, axis=0)   # (S, B, E_pad) f32
    h = emb.astype(compute_dtype)

    # Three stacked LSTM layers; each = hoisted input projection + serial recurrence.
    for layer in prepared["lstm_layers"]:
        h = lstm_layer(h, layer["w_ih_t"], layer["w_hh_t"], layer["bias"],
                       time_chunk=time_chunk)

    # Tied decoder (bias == 0 by construction, so it is dropped).
    S, B, Ep = h.shape
    logits = tiled_matmul(h.reshape(S * B, Ep), prepared["dec_w_t"],
                          out_dtype=jnp.float32)
    # Slice away the lane-padding on the vocab dimension.
    return logits[:, :vocab_size].reshape(S, B, vocab_size)


if __name__ == "__main__":
    # Small, shape-consistent config (paper defaults: E=400, H=1150, V=30002, L=3).
    # Deliberately non-128-multiples to exercise the lane-padding paths.
    VOCAB = 100
    EMB = 48
    HIDDEN = 96
    NUM_LAYERS = 3
    SEQ = 16
    BATCH = 8

    key = jax.random.PRNGKey(0)
    pkey, xkey = jax.random.split(key)
    params = make_params(pkey, VOCAB, EMB, HIDDEN, NUM_LAYERS)
    prepared = prepare_params(params)

    # token ids, time-major (seq, batch), matching nn.LSTM batch_first=False.
    token_ids = jax.random.randint(xkey, (SEQ, BATCH), 0, VOCAB, dtype=jnp.int32)

    out = reclm_forward(prepared, token_ids, vocab_size=VOCAB, time_chunk=8)
    out = jax.block_until_ready(out)

    assert out.shape == (SEQ, BATCH, VOCAB), out.shape
    assert bool(jnp.all(jnp.isfinite(out)))
    print("KERNEL_OK")
</pallas_src>

<mosaic_0001>
module attributes {stable_mosaic.version = 11 : i64} {
  func.func @_matmul_bias_kernel(%arg0: i32, %arg1: i32, %arg2: memref<128x128xbf16, #tpu.memory_space<vmem>>, %arg3: memref<128x512xbf16, #tpu.memory_space<vmem>>, %arg4: memref<1x512xf32, #tpu.memory_space<vmem>>, %arg5: memref<128x512xbf16, #tpu.memory_space<vmem>>) attributes {dimension_semantics = [#tpu.dimension_semantics<parallel>, #tpu.dimension_semantics<parallel>], iteration_bounds = array<i64: 1, 1>, scalar_prefetch = 0 : i64, scratch_operands = 0 : i64, tpu.core_type = #tpu.core_type<tc>, window_params = [{transform_indices = @transform_0, window_bounds = array<i64: 128, 128>}, {transform_indices = @transform_1, window_bounds = array<i64: 128, 512>}, {transform_indices = @transform_2, window_bounds = array<i64: 1, 512>}, {transform_indices = @transform_3, window_bounds = array<i64: 128, 512>}]} {
    %c0 = arith.constant 0 : index
    %c0_0 = arith.constant 0 : index
    %0 = vector.load %arg2[%c0, %c0_0] : memref<128x128xbf16, #tpu.memory_space<vmem>>, vector<128x128xbf16>
    %c0_1 = arith.constant 0 : index
    %c0_2 = arith.constant 0 : index
    %1 = vector.load %arg3[%c0_1, %c0_2] : memref<128x512xbf16, #tpu.memory_space<vmem>>, vector<128x512xbf16>
    %cst = arith.constant dense<0.000000e+00> : vector<128x512xf32>
    %2 = tpu.matmul %0, %1, %cst {dimension_numbers = #tpu.dot_dimension_numbers<[1], [0], [0], [1], [0, 0, 1, 1], [], []>} : vector<128x128xbf16>, vector<128x512xbf16>, vector<128x512xf32> -> vector<128x512xf32>
    %c0_3 = arith.constant 0 : index
    %c0_4 = arith.constant 0 : index
    %3 = vector.load %arg4[%c0_3, %c0_4] : memref<1x512xf32, #tpu.memory_space<vmem>>, vector<1x512xf32>
    %4 = vector.broadcast %3 : vector<1x512xf32> to vector<128x512xf32>
    %5 = arith.addf %2, %4 : vector<128x512xf32>
    %6 = arith.truncf %5 : vector<128x512xf32> to vector<128x512xbf16>
    %c0_5 = arith.constant 0 : index
    %c0_6 = arith.constant 0 : index
    %7 = vector.load %arg5[%c0_5, %c0_6] : memref<128x512xbf16, #tpu.memory_space<vmem>>, vector<128x512xbf16>
    tpu.vector_store %arg5[%c0_5, %c0_6], %6 {strides = array<i32>} : memref<128x512xbf16, #tpu.memory_space<vmem>>, vector<128x512xbf16>,
    return
  }
  func.func @transform_0(%arg0: i32, %arg1: i32) -> (i32, i32) {
    %c0_i32 = arith.constant 0 : i32
    %c0_i32_0 = arith.constant 0 : i32
    return %arg0, %c0_i32 : i32, i32
  }
  func.func @transform_1(%arg0: i32, %arg1: i32) -> (i32, i32) {
    %c0_i32 = arith.constant 0 : i32
    %c0_i32_0 = arith.constant 0 : i32
    return %c0_i32, %arg1 : i32, i32
  }
  func.func @transform_2(%arg0: i32, %arg1: i32) -> (i32, i32) {
    %c0_i32 = arith.constant 0 : i32
    %c0_i32_0 = arith.constant 0 : i32
    return %c0_i32, %arg1 : i32, i32
  }
  func.func @transform_3(%arg0: i32, %arg1: i32) -> (i32, i32) {
    %c0_i32 = arith.constant 0 : i32
    return %arg0, %arg1 : i32, i32
  }
}

module attributes {stable_mosaic.version = 11 : i64} {
  func.func @_matmul_kernel(%arg0: i32, %arg1: i32, %arg2: memref<128x128xbf16, #tpu.memory_space<vmem>>, %arg3: memref<128x128xbf16, #tpu.memory_space<vmem>>, %arg4: memref<128x128xf32, #tpu.memory_space<vmem>>) attributes {dimension_semantics = [#tpu.dimension_semantics<parallel>, #tpu.dimension_semantics<parallel>], iteration_bounds = array<i64: 1, 1>, scalar_prefetch = 0 : i64, scratch_operands = 0 : i64, tpu.core_type = #tpu.core_type<tc>, window_params = [{transform_indices = @transform_0, window_bounds = array<i64: 128, 128>}, {transform_indices = @transform_1, window_bounds = array<i64: 128, 128>}, {transform_indices = @transform_2, window_bounds = array<i64: 128, 128>}]} {
    %c0 = arith.constant 0 : index
    %c0_0 = arith.constant 0 : index
    %0 = vector.load %arg2[%c0, %c0_0] : memref<128x128xbf16, #tpu.memory_space<vmem>>, vector<128x128xbf16>
    %c0_1 = arith.constant 0 : index
    %c0_2 = arith.constant 0 : index
    %1 = vector.load %arg3[%c0_1, %c0_2] : memref<128x128xbf16, #tpu.memory_space<vmem>>, vector<128x128xbf16>
    %cst = arith.constant dense<0.000000e+00> : vector<128x128xf32>
    %2 = tpu.matmul %0, %1, %cst {dimension_numbers = #tpu.dot_dimension_numbers<[1], [0], [0], [1], [0, 0, 1, 1], [], []>} : vector<128x128xbf16>, vector<128x128xbf16>, vector<128x128xf32> -> vector<128x128xf32>
    %c0_3 = arith.constant 0 : index
    %c0_4 = arith.constant 0 : index
    %3 = vector.load %arg4[%c0_3, %c0_4] : memref<128x128xf32, #tpu.memory_space<vmem>>, vector<128x128xf32>
    tpu.vector_store %arg4[%c0_3, %c0_4], %2 {strides = array<i32>} : memref<128x128xf32, #tpu.memory_space<vmem>>, vector<128x128xf32>,
    return
  }
  func.func @transform_0(%arg0: i32, %arg1: i32) -> (i32, i32) {
    %c0_i32 = arith.constant 0 : i32
    %c0_i32_0 = arith.constant 0 : i32
    return %arg0, %c0_i32 : i32, i32
  }
  func.func @transform_1(%arg0: i32, %arg1: i32) -> (i32, i32) {
    %c0_i32 = arith.constant 0 : i32
    %c0_i32_0 = arith.constant 0 : i32
    return %c0_i32, %arg1 : i32, i32
  }
  func.func @transform_2(%arg0: i32, %arg1: i32) -> (i32, i32) {
    %c0_i32 = arith.constant 0 : i32
    return %arg0, %arg1 : i32, i32
  }
}

module attributes {stable_mosaic.version = 11 : i64} {
  func.func @lstm_recurrent_kernel(%arg0: i32, %arg1: memref<8x8x512xbf16, #tpu.memory_space<vmem>>, %arg2: memref<128x512xbf16, #tpu.memory_space<vmem>>, %arg3: memref<8x8x128xbf16, #tpu.memory_space<vmem>>, %arg4: memref<8x128xf32, #tpu.memory_space<vmem>>, %arg5: memref<8x128xf32, #tpu.memory_space<vmem>>) attributes {dimension_semantics = [#tpu.dimension_semantics<arbitrary>], iteration_bounds = array<i64: 2>, scalar_prefetch = 0 : i64, scratch_operands = 2 : i64, tpu.core_type = #tpu.core_type<tc>, window_params = [{transform_indices = @transform_0, window_bounds = array<i64: 8, 8, 512>}, {pipeline_mode = #tpu.pipeline_mode<synchronous>, transform_indices = @transform_1, window_bounds = array<i64: 128, 512>}, {transform_indices = @transform_2, window_bounds = array<i64: 8, 8, 128>}]} {
    %c0_i32 = arith.constant 0 : i32
    %0 = arith.cmpi eq, %arg0, %c0_i32 : i32
    %1 = arith.extui %0 : i1 to i32
    %c0_i32_0 = arith.constant 0 : i32
    %2 = arith.cmpi ne, %1, %c0_i32_0 : i32
    scf.if %2 {
      %cst_152 = arith.constant 0.000000e+00 : f32
      %323 = vector.broadcast %cst_152 : f32 to vector<8x128xf32>
      %c0_153 = arith.constant 0 : index
      %c0_154 = arith.constant 0 : index
      %324 = vector.load %arg4[%c0_153, %c0_154] : memref<8x128xf32, #tpu.memory_space<vmem>>, vector<8x128xf32>
      tpu.vector_store %arg4[%c0_153, %c0_154], %323 {strides = array<i32>} : memref<8x128xf32, #tpu.memory_space<vmem>>, vector<8x128xf32>,
      %cst_155 = arith.constant 0.000000e+00 : f32
      %325 = vector.broadcast %cst_155 : f32 to vector<8x128xf32>
      %c0_156 = arith.constant 0 : index
      %c0_157 = arith.constant 0 : index
      %326 = vector.load %arg5[%c0_156, %c0_157] : memref<8x128xf32, #tpu.memory_space<vmem>>, vector<8x128xf32>
      tpu.vector_store %arg5[%c0_156, %c0_157], %325 {strides = array<i32>} : memref<8x128xf32, #tpu.memory_space<vmem>>, vector<8x128xf32>,
    } else {
    }
    %c0 = arith.constant 0 : index
    %c0_1 = arith.constant 0 : index
    %3 = vector.load %arg4[%c0, %c0_1] : memref<8x128xf32, #tpu.memory_space<vmem>>, vector<8x128xf32>
    %c0_2 = arith.constant 0 : index
    %c0_3 = arith.constant 0 : index
    %4 = vector.load %arg5[%c0_2, %c0_3] : memref<8x128xf32, #tpu.memory_space<vmem>>, vector<8x128xf32>
    %c0_4 = arith.constant 0 : index
    %c0_5 = arith.constant 0 : index
    %c0_6 = arith.constant 0 : index
    %5 = vector.load %arg1[%c0_4, %c0_5, %c0_6] : memref<8x8x512xbf16, #tpu.memory_space<vmem>>, vector<1x8x512xbf16>
    %6 = vector.shape_cast %5 : vector<1x8x512xbf16> to vector<8x512xbf16>
    %7 = arith.extf %6 : vector<8x512xbf16> to vector<8x512xf32>
    %8 = arith.truncf %3 : vector<8x128xf32> to vector<8x128xbf16>
    %c0_7 = arith.constant 0 : index
    %c0_8 = arith.constant 0 : index
    %9 = vector.load %arg2[%c0_7, %c0_8] : memref<128x512xbf16, #tpu.memory_space<vmem>>, vector<128x512xbf16>
    %cst = arith.constant dense<0.000000e+00> : vector<8x512xf32>
    %10 = tpu.matmul %8, %9, %cst {dimension_numbers = #tpu.dot_dimension_numbers<[1], [0], [0], [1], [0, 0, 1, 1], [], []>} : vector<8x128xbf16>, vector<128x512xbf16>, vector<8x512xf32> -> vector<8x512xf32>
    %11 = arith.addf %7, %10 : vector<8x512xf32>
    %12 = vector.extract_strided_slice %11 {offsets = [0, 0], sizes = [8, 128], strides = [1, 1]} : vector<8x512xf32> to vector<8x128xf32>
    %13 = arith.negf %12 : vector<8x128xf32>
    %14 = math.exp %13 : vector<8x128xf32>
    %cst_9 = arith.constant 1.000000e+00 : f32
    %15 = vector.broadcast %cst_9 : f32 to vector<8x128xf32>
    %16 = arith.addf %15, %14 : vector<8x128xf32>
    %17 = arith.divf %15, %16 : vector<8x128xf32>
    %18 = vector.extract_strided_slice %11 {offsets = [0, 128], sizes = [8, 128], strides = [1, 1]} : vector<8x512xf32> to vector<8x128xf32>
    %19 = arith.negf %18 : vector<8x128xf32>
    %20 = math.exp %19 : vector<8x128xf32>
    %cst_10 = arith.constant 1.000000e+00 : f32
    %21 = vector.broadcast %cst_10 : f32 to vector<8x128xf32>
    %22 = arith.addf %21, %20 : vector<8x128xf32>
    %23 = arith.divf %21, %22 : vector<8x128xf32>
    %24 = vector.extract_strided_slice %11 {offsets = [0, 256], sizes = [8, 128], strides = [1, 1]} : vector<8x512xf32> to vector<8x128xf32>
    %25 = math.tanh %24 : vector<8x128xf32>
    %26 = vector.extract_strided_slice %11 {offsets = [0, 384], sizes = [8, 128], strides = [1, 1]} : vector<8x512xf32> to vector<8x128xf32>
    %27 = arith.negf %26 : vector<8x128xf32>
    %28 = math.exp %27 : vector<8x128xf32>
    %cst_11 = arith.constant 1.000000e+00 : f32
    %29 = vector.broadcast %cst_11 : f32 to vector<8x128xf32>
    %30 = arith.addf %29, %28 : vector<8x128xf32>
    %31 = arith.divf %29, %30 : vector<8x128xf32>
    %32 = arith.mulf %23, %4 : vector<8x128xf32>
    %33 = arith.mulf %17, %25 : vector<8x128xf32>
    %34 = arith.addf %32, %33 : vector<8x128xf32>
    %35 = math.tanh %34 : vector<8x128xf32>
    %36 = arith.mulf %31, %35 : vector<8x128xf32>
    %c0_12 = arith.constant 0 : index
    %c0_13 = arith.constant 0 : index
    %37 = vector.load %arg5[%c0_12, %c0_13] : memref<8x128xf32, #tpu.memory_space<vmem>>, vector<8x128xf32>
    tpu.vector_store %arg5[%c0_12, %c0_13], %34 {strides = array<i32>} : memref<8x128xf32, #tpu.memory_space<vmem>>, vector<8x128xf32>,
    %c0_14 = arith.constant 0 : index
    %c0_15 = arith.constant 0 : index
    %38 = vector.load %arg4[%c0_14, %c0_15] : memref<8x128xf32, #tpu.memory_space<vmem>>, vector<8x128xf32>
    tpu.vector_store %arg4[%c0_14, %c0_15], %36 {strides = array<i32>} : memref<8x128xf32, #tpu.memory_space<vmem>>, vector<8x128xf32>,
    %39 = arith.truncf %36 : vector<8x128xf32> to vector<8x128xbf16>
    %c0_16 = arith.constant 0 : index
    %c0_17 = arith.constant 0 : index
    %c0_18 = arith.constant 0 : index
    %40 = vector.load %arg3[%c0_16, %c0_17, %c0_18] : memref<8x8x128xbf16, #tpu.memory_space<vmem>>, vector<1x8x128xbf16>
    %41 = vector.shape_cast %40 : vector<1x8x128xbf16> to vector<8x128xbf16>
    %42 = vector.shape_cast %39 : vector<8x128xbf16> to vector<1x8x128xbf16>
    tpu.vector_store %arg3[%c0_16, %c0_17, %c0_18], %42 {strides = array<i32>} : memref<8x8x128xbf16, #tpu.memory_space<vmem>>, vector<1x8x128xbf16>,
    %c0_19 = arith.constant 0 : index
    %c0_20 = arith.constant 0 : index
    %43 = vector.load %arg4[%c0_19, %c0_20] : memref<8x128xf32, #tpu.memory_space<vmem>>, vector<8x128xf32>
    %c0_21 = arith.constant 0 : index
    %c0_22 = arith.constant 0 : index
    %44 = vector.load %arg5[%c0_21, %c0_22] : memref<8x128xf32, #tpu.memory_space<vmem>>, vector<8x128xf32>
    %c1 = arith.constant 1 : index
    %c0_23 = arith.constant 0 : index
    %c0_24 = arith.constant 0 : index
    %45 = vector.load %arg1[%c1, %c0_23, %c0_24] : memref<8x8x512xbf16, #tpu.memory_space<vmem>>, vector<1x8x512xbf16>
    %46 = vector.shape_cast %45 : vector<1x8x512xbf16> to vector<8x512xbf16>
    %47 = arith.extf %46 : vector<8x512xbf16> to vector<8x512xf32>
    %48 = arith.truncf %43 : vector<8x128xf32> to vector<8x128xbf16>
    %c0_25 = arith.constant 0 : index
    %c0_26 = arith.constant 0 : index
    %49 = vector.load %arg2[%c0_25, %c0_26] : memref<128x512xbf16, #tpu.memory_space<vmem>>, vector<128x512xbf16>
    %cst_27 = arith.constant dense<0.000000e+00> : vector<8x512xf32>
    %50 = tpu.matmul %48, %49, %cst_27 {dimension_numbers = #tpu.dot_dimension_numbers<[1], [0], [0], [1], [0, 0, 1, 1], [], []>} : vector<8x128xbf16>, vector<128x512xbf16>, vector<8x512xf32> -> vector<8x512xf32>
    %51 = arith.addf %47, %50 : vector<8x512xf32>
    %52 = vector.extract_strided_slice %51 {offsets = [0, 0], sizes = [8, 128], strides = [1, 1]} : vector<8x512xf32> to vector<8x128xf32>
    %53 = arith.negf %52 : vector<8x128xf32>
    %54 = math.exp %53 : vector<8x128xf32>
    %cst_28 = arith.constant 1.000000e+00 : f32
    %55 = vector.broadcast %cst_28 : f32 to vector<8x128xf32>
    %56 = arith.addf %55, %54 : vector<8x128xf32>
    %57 = arith.divf %55, %56 : vector<8x128xf32>
    %58 = vector.extract_strided_slice %51 {offsets = [0, 128], sizes = [8, 128], strides = [1, 1]} : vector<8x512xf32> to vector<8x128xf32>
    %59 = arith.negf %58 : vector<8x128xf32>
    %60 = math.exp %59 : vector<8x128xf32>
    %cst_29 = arith.constant 1.000000e+00 : f32
    %61 = vector.broadcast %cst_29 : f32 to vector<8x128xf32>
    %62 = arith.addf %61, %60 : vector<8x128xf32>
    %63 = arith.divf %61, %62 : vector<8x128xf32>
    %64 = vector.extract_strided_slice %51 {offsets = [0, 256], sizes = [8, 128], strides = [1, 1]} : vector<8x512xf32> to vector<8x128xf32>
    %65 = math.tanh %64 : vector<8x128xf32>
    %66 = vector.extract_strided_slice %51 {offsets = [0, 384], sizes = [8, 128], strides = [1, 1]} : vector<8x512xf32> to vector<8x128xf32>
    %67 = arith.negf %66 : vector<8x128xf32>
    %68 = math.exp %67 : vector<8x128xf32>
    %cst_30 = arith.constant 1.000000e+00 : f32
    %69 = vector.broadcast %cst_30 : f32 to vector<8x128xf32>
    %70 = arith.addf %69, %68 : vector<8x128xf32>
    %71 = arith.divf %69, %70 : vector<8x128xf32>
    %72 = arith.mulf %63, %44 : vector<8x128xf32>
    %73 = arith.mulf %57, %65 : vector<8x128xf32>
    %74 = arith.addf %72, %73 : vector<8x128xf32>
    %75 = math.tanh %74 : vector<8x128xf32>
    %76 = arith.mulf %71, %75 : vector<8x128xf32>
    %c0_31 = arith.constant 0 : index
    %c0_32 = arith.constant 0 : index
    %77 = vector.load %arg5[%c0_31, %c0_32] : memref<8x128xf32, #tpu.memory_space<vmem>>, vector<8x128xf32>
    tpu.vector_store %arg5[%c0_31, %c0_32], %74 {strides = array<i32>} : memref<8x128xf32, #tpu.memory_space<vmem>>, vector<8x128xf32>,
    %c0_33 = arith.constant 0 : index
    %c0_34 = arith.constant 0 : index
    %78 = vector.load %arg4[%c0_33, %c0_34] : memref<8x128xf32, #tpu.memory_space<vmem>>, vector<8x128xf32>
    tpu.vector_store %arg4[%c0_33, %c0_34], %76 {strides = array<i32>} : memref<8x128xf32, #tpu.memory_space<vmem>>, vector<8x128xf32>,
    %79 = arith.truncf %76 : vector<8x128xf32> to vector<8x128xbf16>
    %c1_35 = arith.constant 1 : index
    %c0_36 = arith.constant 0 : index
    %c0_37 = arith.constant 0 : index
    %80 = vector.load %arg3[%c1_35, %c0_36, %c0_37] : memref<8x8x128xbf16, #tpu.memory_space<vmem>>, vector<1x8x128xbf16>
    %81 = vector.shape_cast %80 : vector<1x8x128xbf16> to vector<8x128xbf16>
    %82 = vector.shape_cast %79 : vector<8x128xbf16> to vector<1x8x128xbf16>
    tpu.vector_store %arg3[%c1_35, %c0_36, %c0_37], %82 {strides = array<i32>} : memref<8x8x128xbf16, #tpu.memory_space<vmem>>, vector<1x8x128xbf16>,
    %c0_38 = arith.constant 0 : index
    %c0_39 = arith.constant 0 : index
    %83 = vector.load %arg4[%c0_38, %c0_39] : memref<8x128xf32, #tpu.memory_space<vmem>>, vector<8x128xf32>
    %c0_40 = arith.constant 0 : index
    %c0_41 = arith.constant 0 : index
    %84 = vector.load %arg5[%c0_40, %c0_41] : memref<8x128xf32, #tpu.memory_space<vmem>>, vector<8x128xf32>
    %c2 = arith.constant 2 : index
    %c0_42 = arith.constant 0 : index
    %c0_43 = arith.constant 0 : index
    %85 = vector.load %arg1[%c2, %c0_42, %c0_43] : memref<8x8x512xbf16, #tpu.memory_space<vmem>>, vector<1x8x512xbf16>
    %86 = vector.shape_cast %85 : vector<1x8x512xbf16> to vector<8x512xbf16>
    %87 = arith.extf %86 : vector<8x512xbf16> to vector<8x512xf32>
    %88 = arith.truncf %83 : vector<8x128xf32> to vector<8x128xbf16>
    %c0_44 = arith.constant 0 : index
    %c0_45 = arith.constant 0 : index
    %89 = vector.load %arg2[%c0_44, %c0_45] : memref<128x512xbf16, #tpu.memory_space<vmem>>, vector<128x512xbf16>
    %cst_46 = arith.constant dense<0.000000e+00> : vector<8x512xf32>
    %90 = tpu.matmul %88, %89, %cst_46 {dimension_numbers = #tpu.dot_dimension_numbers<[1], [0], [0], [1], [0, 0, 1, 1], [], []>} : vector<8x128xbf16>, vector<128x512xbf16>, vector<8x512xf32> -> vector<8x512xf32>
    %91 = arith.addf %87, %90 : vector<8x512xf32>
    %92 = vector.extract_strided_slice %91 {offsets = [0, 0], sizes = [8, 128], strides = [1, 1]} : vector<8x512xf32> to vector<8x128xf32>
    %93 = arith.negf %92 : vector<8x128xf32>
    %94 = math.exp %93 : vector<8x128xf32>
    %cst_47 = arith.constant 1.000000e+00 : f32
    %95 = vector.broadcast %cst_47 : f32 to vector<8x128xf32>
    %96 = arith.addf %95, %94 : vector<8x128xf32>
    %97 = arith.divf %95, %96 : vector<8x128xf32>
    %98 = vector.extract_strided_slice %91 {offsets = [0, 128], sizes = [8, 128], strides = [1, 1]} : vector<8x512xf32> to vector<8x128xf32>
    %99 = arith.negf %98 : vector<8x128xf32>
    %100 = math.exp %99 : vector<8x128xf32>
    %cst_48 = arith.constant 1.000000e+00 : f32
    %101 = vector.broadcast %cst_48 : f32 to vector<8x128xf32>
    %102 = arith.addf %101, %100 : vector<8x128xf32>
    %103 = arith.divf %101, %102 : vector<8x128xf32>
    %104 = vector.extract_strided_slice %91 {offsets = [0, 256], sizes = [8, 128], strides = [1, 1]} : vector<8x512xf32> to vector<8x128xf32>
    %105 = math.tanh %104 : vector<8x128xf32>
    %106 = vector.extract_strided_slice %91 {offsets = [0, 384], sizes = [8, 128], strides = [1, 1]} : vector<8x512xf32> to vector<8x128xf32>
    %107 = arith.negf %106 : vector<8x128xf32>
    %108 = math.exp %107 : vector<8x128xf32>
    %cst_49 = arith.constant 1.000000e+00 : f32
    %109 = vector.broadcast %cst_49 : f32 to vector<8x128xf32>
    %110 = arith.addf %109, %108 : vector<8x128xf32>
    %111 = arith.divf %109, %110 : vector<8x128xf32>
    %112 = arith.mulf %103, %84 : vector<8x128xf32>
    %113 = arith.mulf %97, %105 : vector<8x128xf32>
    %114 = arith.addf %112, %113 : vector<8x128xf32>
    %115 = math.tanh %114 : vector<8x128xf32>
    %116 = arith.mulf %111, %115 : vector<8x128xf32>
    %c0_50 = arith.constant 0 : index
    %c0_51 = arith.constant 0 : index
    %117 = vector.load %arg5[%c0_50, %c0_51] : memref<8x128xf32, #tpu.memory_space<vmem>>, vector<8x128xf32>
    tpu.vector_store %arg5[%c0_50, %c0_51], %114 {strides = array<i32>} : memref<8x128xf32, #tpu.memory_space<vmem>>, vector<8x128xf32>,
    %c0_52 = arith.constant 0 : index
    %c0_53 = arith.constant 0 : index
    %118 = vector.load %arg4[%c0_52, %c0_53] : memref<8x128xf32, #tpu.memory_space<vmem>>, vector<8x128xf32>
    tpu.vector_store %arg4[%c0_52, %c0_53], %116 {strides = array<i32>} : memref<8x128xf32, #tpu.memory_space<vmem>>, vector<8x128xf32>,
    %119 = arith.truncf %116 : vector<8x128xf32> to vector<8x128xbf16>
    %c2_54 = arith.constant 2 : index
    %c0_55 = arith.constant 0 : index
    %c0_56 = arith.constant 0 : index
    %120 = vector.load %arg3[%c2_54, %c0_55, %c0_56] : memref<8x8x128xbf16, #tpu.memory_space<vmem>>, vector<1x8x128xbf16>
    %121 = vector.shape_cast %120 : vector<1x8x128xbf16> to vector<8x128xbf16>
    %122 = vector.shape_cast %119 : vector<8x128xbf16> to vector<1x8x128xbf16>
    tpu.vector_store %arg3[%c2_54, %c0_55, %c0_56], %122 {strides = array<i32>} : memref<8x8x128xbf16, #tpu.memory_space<vmem>>, vector<1x8x128xbf16>,
    %c0_57 = arith.constant 0 : index
    %c0_58 = arith.constant 0 : index
    %123 = vector.load %arg4[%c0_57, %c0_58] : memref<8x128xf32, #tpu.memory_space<vmem>>, vector<8x128xf32>
    %c0_59 = arith.constant 0 : index
    %c0_60 = arith.constant 0 : index
    %124 = vector.load %arg5[%c0_59, %c0_60] : memref<8x128xf32, #tpu.memory_space<vmem>>, vector<8x128xf32>
    %c3 = arith.constant 3 : index
    %c0_61 = arith.constant 0 : index
    %c0_62 = arith.constant 0 : index
    %125 = vector.load %arg1[%c3, %c0_61, %c0_62] : memref<8x8x512xbf16, #tpu.memory_space<vmem>>, vector<1x8x512xbf16>
    %126 = vector.shape_cast %125 : vector<1x8x512xbf16> to vector<8x512xbf16>
    %127 = arith.extf %126 : vector<8x512xbf16> to vector<8x512xf32>
    %128 = arith.truncf %123 : vector<8x128xf32> to vector<8x128xbf16>
    %c0_63 = arith.constant 0 : index
    %c0_64 = arith.constant 0 : index
    %129 = vector.load %arg2[%c0_63, %c0_64] : memref<128x512xbf16, #tpu.memory_space<vmem>>, vector<128x512xbf16>
    %cst_65 = arith.constant dense<0.000000e+00> : vector<8x512xf32>
    %130 = tpu.matmul %128, %129, %cst_65 {dimension_numbers = #tpu.dot_dimension_numbers<[1], [0], [0], [1], [0, 0, 1, 1], [], []>} : vector<8x128xbf16>, vector<128x512xbf16>, vector<8x512xf32> -> vector<8x512xf32>
    %131 = arith.addf %127, %130 : vector<8x512xf32>
    %132 = vector.extract_strided_slice %131 {offsets = [0, 0], sizes = [8, 128], strides = [1, 1]} : vector<8x512xf32> to vector<8x128xf32>
    %133 = arith.negf %132 : vector<8x128xf32>
    %134 = math.exp %133 : vector<8x128xf32>
    %cst_66 = arith.constant 1.000000e+00 : f32
    %135 = vector.broadcast %cst_66 : f32 to vector<8x128xf32>
    %136 = arith.addf %135, %134 : vector<8x128xf32>
    %137 = arith.divf %135, %136 : vector<8x128xf32>
    %138 = vector.extract_strided_slice %131 {offsets = [0, 128], sizes = [8, 128], strides = [1, 1]} : vector<8x512xf32> to vector<8x128xf32>
    %139 = arith.negf %138 : vector<8x128xf32>
    %140 = math.exp %139 : vector<8x128xf32>
    %cst_67 = arith.constant 1.000000e+00 : f32
    %141 = vector.broadcast %cst_67 : f32 to vector<8x128xf32>
    %142 = arith.addf %141, %140 : vector<8x128xf32>
    %143 = arith.divf %141, %142 : vector<8x128xf32>
    %144 = vector.extract_strided_slice %131 {offsets = [0, 256], sizes = [8, 128], strides = [1, 1]} : vector<8x512xf32> to vector<8x128xf32>
    %145 = math.tanh %144 : vector<8x128xf32>
    %146 = vector.extract_strided_slice %131 {offsets = [0, 384], sizes = [8, 128], strides = [1, 1]} : vector<8x512xf32> to vector<8x128xf32>
    %147 = arith.negf %146 : vector<8x128xf32>
    %148 = math.exp %147 : vector<8x128xf32>
    %cst_68 = arith.constant 1.000000e+00 : f32
    %149 = vector.broadcast %cst_68 : f32 to vector<8x128xf32>
    %150 = arith.addf %149, %148 : vector<8x128xf32>
    %151 = arith.divf %149, %150 : vector<8x128xf32>
    %152 = arith.mulf %143, %124 : vector<8x128xf32>
    %153 = arith.mulf %137, %145 : vector<8x128xf32>
    %154 = arith.addf %152, %153 : vector<8x128xf32>
    %155 = math.tanh %154 : vector<8x128xf32>
    %156 = arith.mulf %151, %155 : vector<8x128xf32>
    %c0_69 = arith.constant 0 : index
    %c0_70 = arith.constant 0 : index
    %157 = vector.load %arg5[%c0_69, %c0_70] : memref<8x128xf32, #tpu.memory_space<vmem>>, vector<8x128xf32>
    tpu.vector_store %arg5[%c0_69, %c0_70], %154 {strides = array<i32>} : memref<8x128xf32, #tpu.memory_space<vmem>>, vector<8x128xf32>,
    %c0_71 = arith.constant 0 : index
    %c0_72 = arith.constant 0 : index
    %158 = vector.load %arg4[%c0_71, %c0_72] : memref<8x128xf32, #tpu.memory_space<vmem>>, vector<8x128xf32>
    tpu.vector_store %arg4[%c0_71, %c0_72], %156 {strides = array<i32>} : memref<8x128xf32, #tpu.memory_space<vmem>>, vector<8x128xf32>,
    %159 = arith.truncf %156 : vector<8x128xf32> to vector<8x128xbf16>
    %c3_73 = arith.constant 3 : index
    %c0_74 = arith.constant 0 : index
    %c0_75 = arith.constant 0 : index
    %160 = vector.load %arg3[%c3_73, %c0_74, %c0_75] : memref<8x8x128xbf16, #tpu.memory_space<vmem>>, vector<1x8x128xbf16>
    %161 = vector.shape_cast %160 : vector<1x8x128xbf16> to vector<8x128xbf16>
    %162 = vector.shape_cast %159 : vector<8x128xbf16> to vector<1x8x128xbf16>
    tpu.vector_store %arg3[%c3_73, %c0_74, %c0_75], %162 {strides = array<i32>} : memref<8x8x128xbf16, #tpu.memory_space<vmem>>, vector<1x8x128xbf16>,
    %c0_76 = arith.constant 0 : index
    %c0_77 = arith.constant 0 : index
    %163 = vector.load %arg4[%c0_76, %c0_77] : memref<8x128xf32, #tpu.memory_space<vmem>>, vector<8x128xf32>
    %c0_78 = arith.constant 0 : index
    %c0_79 = arith.constant 0 : index
    %164 = vector.load %arg5[%c0_78, %c0_79] : memref<8x128xf32, #tpu.memory_space<vmem>>, vector<8x128xf32>
    %c4 = arith.constant 4 : index
    %c0_80 = arith.constant 0 : index
    %c0_81 = arith.constant 0 : index
    %165 = vector.load %arg1[%c4, %c0_80, %c0_81] : memref<8x8x512xbf16, #tpu.memory_space<vmem>>, vector<1x8x512xbf16>
    %166 = vector.shape_cast %165 : vector<1x8x512xbf16> to vector<8x512xbf16>
    %167 = arith.extf %166 : vector<8x512xbf16> to vector<8x512xf32>
    %168 = arith.truncf %163 : vector<8x128xf32> to vector<8x128xbf16>
    %c0_82 = arith.constant 0 : index
    %c0_83 = arith.constant 0 : index
    %169 = vector.load %arg2[%c0_82, %c0_83] : memref<128x512xbf16, #tpu.memory_space<vmem>>, vector<128x512xbf16>
    %cst_84 = arith.constant dense<0.000000e+00> : vector<8x512xf32>
    %170 = tpu.matmul %168, %169, %cst_84 {dimension_numbers = #tpu.dot_dimension_numbers<[1], [0], [0], [1], [0, 0, 1, 1], [], []>} : vector<8x128xbf16>, vector<128x512xbf16>, vector<8x512xf32> -> vector<8x512xf32>
    %171 = arith.addf %167, %170 : vector<8x512xf32>
    %172 = vector.extract_strided_slice %171 {offsets = [0, 0], sizes = [8, 128], strides = [1, 1]} : vector<8x512xf32> to vector<8x128xf32>
    %173 = arith.negf %172 : vector<8x128xf32>
    %174 = math.exp %173 : vector<8x128xf32>
    %cst_85 = arith.constant 1.000000e+00 : f32
    %175 = vector.broadcast %cst_85 : f32 to vector<8x128xf32>
    %176 = arith.addf %175, %174 : vector<8x128xf32>
    %177 = arith.divf %175, %176 : vector<8x128xf32>
    %178 = vector.extract_strided_slice %171 {offsets = [0, 128], sizes = [8, 128], strides = [1, 1]} : vector<8x512xf32> to vector<8x128xf32>
    %179 = arith.negf %178 : vector<8x128xf32>
    %180 = math.exp %179 : vector<8x128xf32>
    %cst_86 = arith.constant 1.000000e+00 : f32
    %181 = vector.broadcast %cst_86 : f32 to vector<8x128xf32>
    %182 = arith.addf %181, %180 : vector<8x128xf32>
    %183 = arith.divf %181, %182 : vector<8x128xf32>
    %184 = vector.extract_strided_slice %171 {offsets = [0, 256], sizes = [8, 128], strides = [1, 1]} : vector<8x512xf32> to vector<8x128xf32>
    %185 = math.tanh %184 : vector<8x128xf32>
    %186 = vector.extract_strided_slice %171 {offsets = [0, 384], sizes = [8, 128], strides = [1, 1]} : vector<8x512xf32> to vector<8x128xf32>
    %187 = arith.negf %186 : vector<8x128xf32>
    %188 = math.exp %187 : vector<8x128xf32>
    %cst_87 = arith.constant 1.000000e+00 : f32
    %189 = vector.broadcast %cst_87 : f32 to vector<8x128xf32>
    %190 = arith.addf %189, %188 : vector<8x128xf32>
    %191 = arith.divf %189, %190 : vector<8x128xf32>
    %192 = arith.mulf %183, %164 : vector<8x128xf32>
    %193 = arith.mulf %177, %185 : vector<8x128xf32>
    %194 = arith.addf %192, %193 : vector<8x128xf32>
    %195 = math.tanh %194 : vector<8x128xf32>
    %196 = arith.mulf %191, %195 : vector<8x128xf32>
    %c0_88 = arith.constant 0 : index
    %c0_89 = arith.constant 0 : index
    %197 = vector.load %arg5[%c0_88, %c0_89] : memref<8x128xf32, #tpu.memory_space<vmem>>, vector<8x128xf32>
    tpu.vector_store %arg5[%c0_88, %c0_89], %194 {strides = array<i32>} : memref<8x128xf32, #tpu.memory_space<vmem>>, vector<8x128xf32>,
    %c0_90 = arith.constant 0 : index
    %c0_91 = arith.constant 0 : index
    %198 = vector.load %arg4[%c0_90, %c0_91] : memref<8x128xf32, #tpu.memory_space<vmem>>, vector<8x128xf32>
    tpu.vector_store %arg4[%c0_90, %c0_91], %196 {strides = array<i32>} : memref<8x128xf32, #tpu.memory_space<vmem>>, vector<8x128xf32>,
    %199 = arith.truncf %196 : vector<8x128xf32> to vector<8x128xbf16>
    %c4_92 = arith.constant 4 : index
    %c0_93 = arith.constant 0 : index
    %c0_94 = arith.constant 0 : index
    %200 = vector.load %arg3[%c4_92, %c0_93, %c0_94] : memref<8x8x128xbf16, #tpu.memory_space<vmem>>, vector<1x8x128xbf16>
    %201 = vector.shape_cast %200 : vector<1x8x128xbf16> to vector<8x128xbf16>
    %202 = vector.shape_cast %199 : vector<8x128xbf16> to vector<1x8x128xbf16>
    tpu.vector_store %arg3[%c4_92, %c0_93, %c0_94], %202 {strides = array<i32>} : memref<8x8x128xbf16, #tpu.memory_space<vmem>>, vector<1x8x128xbf16>,
    %c0_95 = arith.constant 0 : index
    %c0_96 = arith.constant 0 : index
    %203 = vector.load %arg4[%c0_95, %c0_96] : memref<8x128xf32, #tpu.memory_space<vmem>>, vector<8x128xf32>
    %c0_97 = arith.constant 0 : index
    %c0_98 = arith.constant 0 : index
    %204 = vector.load %arg5[%c0_97, %c0_98] : memref<8x128xf32, #tpu.memory_space<vmem>>, vector<8x128xf32>
    %c5 = arith.constant 5 : index
    %c0_99 = arith.constant 0 : index
    %c0_100 = arith.constant 0 : index
    %205 = vector.load %arg1[%c5, %c0_99, %c0_100] : memref<8x8x512xbf16, #tpu.memory_space<vmem>>, vector<1x8x512xbf16>
    %206 = vector.shape_cast %205 : vector<1x8x512xbf16> to vector<8x512xbf16>
    %207 = arith.extf %206 : vector<8x512xbf16> to vector<8x512xf32>
    %208 = arith.truncf %203 : vector<8x128xf32> to vector<8x128xbf16>
    %c0_101 = arith.constant 0 : index
    %c0_102 = arith.constant 0 : index
    %209 = vector.load %arg2[%c0_101, %c0_102] : memref<128x512xbf16, #tpu.memory_space<vmem>>, vector<128x512xbf16>
    %cst_103 = arith.constant dense<0.000000e+00> : vector<8x512xf32>
    %210 = tpu.matmul %208, %209, %cst_103 {dimension_numbers = #tpu.dot_dimension_numbers<[1], [0], [0], [1], [0, 0, 1, 1], [], []>} : vector<8x128xbf16>, vector<128x512xbf16>, vector<8x512xf32> -> vector<8x512xf32>
    %211 = arith.addf %207, %210 : vector<8x512xf32>
    %212 = vector.extract_strided_slice %211 {offsets = [0, 0], sizes = [8, 128], strides = [1, 1]} : vector<8x512xf32> to vector<8x128xf32>
    %213 = arith.negf %212 : vector<8x128xf32>
    %214 = math.exp %213 : vector<8x128xf32>
    %cst_104 = arith.constant 1.000000e+00 : f32
    %215 = vector.broadcast %cst_104 : f32 to vector<8x128xf32>
    %216 = arith.addf %215, %214 : vector<8x128xf32>
    %217 = arith.divf %215, %216 : vector<8x128xf32>
    %218 = vector.extract_strided_slice %211 {offsets = [0, 128], sizes = [8, 128], strides = [1, 1]} : vector<8x512xf32> to vector<8x128xf32>
    %219 = arith.negf %218 : vector<8x128xf32>
    %220 = math.exp %219 : vector<8x128xf32>
    %cst_105 = arith.constant 1.000000e+00 : f32
    %221 = vector.broadcast %cst_105 : f32 to vector<8x128xf32>
    %222 = arith.addf %221, %220 : vector<8x128xf32>
    %223 = arith.divf %221, %222 : vector<8x128xf32>
    %224 = vector.extract_strided_slice %211 {offsets = [0, 256], sizes = [8, 128], strides = [1, 1]} : vector<8x512xf32> to vector<8x128xf32>
    %225 = math.tanh %224 : vector<8x128xf32>
    %226 = vector.extract_strided_slice %211 {offsets = [0, 384], sizes = [8, 128], strides = [1, 1]} : vector<8x512xf32> to vector<8x128xf32>
    %227 = arith.negf %226 : vector<8x128xf32>
    %228 = math.exp %227 : vector<8x128xf32>
    %cst_106 = arith.constant 1.000000e+00 : f32
    %229 = vector.broadcast %cst_106 : f32 to vector<8x128xf32>
    %230 = arith.addf %229, %228 : vector<8x128xf32>
    %231 = arith.divf %229, %230 : vector<8x128xf32>
    %232 = arith.mulf %223, %204 : vector<8x128xf32>
    %233 = arith.mulf %217, %225 : vector<8x128xf32>
    %234 = arith.addf %232, %233 : vector<8x128xf32>
    %235 = math.tanh %234 : vector<8x128xf32>
    %236 = arith.mulf %231, %235 : vector<8x128xf32>
    %c0_107 = arith.constant 0 : index
    %c0_108 = arith.constant 0 : index
    %237 = vector.load %arg5[%c0_107, %c0_108] : memref<8x128xf32, #tpu.memory_space<vmem>>, vector<8x128xf32>
    tpu.vector_store %arg5[%c0_107, %c0_108], %234 {strides = array<i32>} : memref<8x128xf32, #tpu.memory_space<vmem>>, vector<8x128xf32>,
    %c0_109 = arith.constant 0 : index
    %c0_110 = arith.constant 0 : index
    %238 = vector.load %arg4[%c0_109, %c0_110] : memref<8x128xf32, #tpu.memory_space<vmem>>, vector<8x128xf32>
    tpu.vector_store %arg4[%c0_109, %c0_110], %236 {strides = array<i32>} : memref<8x128xf32, #tpu.memory_space<vmem>>, vector<8x128xf32>,
    %239 = arith.truncf %236 : vector<8x128xf32> to vector<8x128xbf16>
    %c5_111 = arith.constant 5 : index
    %c0_112 = arith.constant 0 : index
    %c0_113 = arith.constant 0 : index
    %240 = vector.load %arg3[%c5_111, %c0_112, %c0_113] : memref<8x8x128xbf16, #tpu.memory_space<vmem>>, vector<1x8x128xbf16>
    %241 = vector.shape_cast %240 : vector<1x8x128xbf16> to vector<8x128xbf16>
    %242 = vector.shape_cast %239 : vector<8x128xbf16> to vector<1x8x128xbf16>
    tpu.vector_store %arg3[%c5_111, %c0_112, %c0_113], %242 {strides = array<i32>} : memref<8x8x128xbf16, #tpu.memory_space<vmem>>, vector<1x8x128xbf16>,
    %c0_114 = arith.constant 0 : index
    %c0_115 = arith.constant 0 : index
    %243 = vector.load %arg4[%c0_114, %c0_115] : memref<8x128xf32, #tpu.memory_space<vmem>>, vector<8x128xf32>
    %c0_116 = arith.constant 0 : index
    %c0_117 = arith.constant 0 : index
    %244 = vector.load %arg5[%c0_116, %c0_117] : memref<8x128xf32, #tpu.memory_space<vmem>>, vector<8x128xf32>
    %c6 = arith.constant 6 : index
    %c0_118 = arith.constant 0 : index
    %c0_119 = arith.constant 0 : index
    %245 = vector.load %arg1[%c6, %c0_118, %c0_119] : memref<8x8x512xbf16, #tpu.memory_space<vmem>>, vector<1x8x512xbf16>
    %246 = vector.shape_cast %245 : vector<1x8x512xbf16> to vector<8x512xbf16>
    %247 = arith.extf %246 : vector<8x512xbf16> to vector<8x512xf32>
    %248 = arith.truncf %243 : vector<8x128xf32> to vector<8x128xbf16>
    %c0_120 = arith.constant 0 : index
    %c0_121 = arith.constant 0 : index
    %249 = vector.load %arg2[%c0_120, %c0_121] : memref<128x512xbf16, #tpu.memory_space<vmem>>, vector<128x512xbf16>
    %cst_122 = arith.constant dense<0.000000e+00> : vector<8x512xf32>
    %250 = tpu.matmul %248, %249, %cst_122 {dimension_numbers = #tpu.dot_dimension_numbers<[1], [0], [0], [1], [0, 0, 1, 1], [], []>} : vector<8x128xbf16>, vector<128x512xbf16>, vector<8x512xf32> -> vector<8x512xf32>
    %251 = arith.addf %247, %250 : vector<8x512xf32>
    %252 = vector.extract_strided_slice %251 {offsets = [0, 0], sizes = [8, 128], strides = [1, 1]} : vector<8x512xf32> to vector<8x128xf32>
    %253 = arith.negf %252 : vector<8x128xf32>
    %254 = math.exp %253 : vector<8x128xf32>
    %cst_123 = arith.constant 1.000000e+00 : f32
    %255 = vector.broadcast %cst_123 : f32 to vector<8x128xf32>
    %256 = arith.addf %255, %254 : vector<8x128xf32>
    %257 = arith.divf %255, %256 : vector<8x128xf32>
    %258 = vector.extract_strided_slice %251 {offsets = [0, 128], sizes = [8, 128], strides = [1, 1]} : vector<8x512xf32> to vector<8x128xf32>
    %259 = arith.negf %258 : vector<8x128xf32>
    %260 = math.exp %259 : vector<8x128xf32>
    %cst_124 = arith.constant 1.000000e+00 : f32
    %261 = vector.broadcast %cst_124 : f32 to vector<8x128xf32>
    %262 = arith.addf %261, %260 : vector<8x128xf32>
    %263 = arith.divf %261, %262 : vector<8x128xf32>
    %264 = vector.extract_strided_slice %251 {offsets = [0, 256], sizes = [8, 128], strides = [1, 1]} : vector<8x512xf32> to vector<8x128xf32>
    %265 = math.tanh %264 : vector<8x128xf32>
    %266 = vector.extract_strided_slice %251 {offsets = [0, 384], sizes = [8, 128], strides = [1, 1]} : vector<8x512xf32> to vector<8x128xf32>
    %267 = arith.negf %266 : vector<8x128xf32>
    %268 = math.exp %267 : vector<8x128xf32>
    %cst_125 = arith.constant 1.000000e+00 : f32
    %269 = vector.broadcast %cst_125 : f32 to vector<8x128xf32>
    %270 = arith.addf %269, %268 : vector<8x128xf32>
    %271 = arith.divf %269, %270 : vector<8x128xf32>
    %272 = arith.mulf %263, %244 : vector<8x128xf32>
    %273 = arith.mulf %257, %265 : vector<8x128xf32>
    %274 = arith.addf %272, %273 : vector<8x128xf32>
    %275 = math.tanh %274 : vector<8x128xf32>
    %276 = arith.mulf %271, %275 : vector<8x128xf32>
    %c0_126 = arith.constant 0 : index
    %c0_127 = arith.constant 0 : index
    %277 = vector.load %arg5[%c0_126, %c0_127] : memref<8x128xf32, #tpu.memory_space<vmem>>, vector<8x128xf32>
    tpu.vector_store %arg5[%c0_126, %c0_127], %274 {strides = array<i32>} : memref<8x128xf32, #tpu.memory_space<vmem>>, vector<8x128xf32>,
    %c0_128 = arith.constant 0 : index
    %c0_129 = arith.constant 0 : index
    %278 = vector.load %arg4[%c0_128, %c0_129] : memref<8x128xf32, #tpu.memory_space<vmem>>, vector<8x128xf32>
    tpu.vector_store %arg4[%c0_128, %c0_129], %276 {strides = array<i32>} : memref<8x128xf32, #tpu.memory_space<vmem>>, vector<8x128xf32>,
    %279 = arith.truncf %276 : vector<8x128xf32> to vector<8x128xbf16>
    %c6_130 = arith.constant 6 : index
    %c0_131 = arith.constant 0 : index
    %c0_132 = arith.constant 0 : index
    %280 = vector.load %arg3[%c6_130, %c0_131, %c0_132] : memref<8x8x128xbf16, #tpu.memory_space<vmem>>, vector<1x8x128xbf16>
    %281 = vector.shape_cast %280 : vector<1x8x128xbf16> to vector<8x128xbf16>
    %282 = vector.shape_cast %279 : vector<8x128xbf16> to vector<1x8x128xbf16>
    tpu.vector_store %arg3[%c6_130, %c0_131, %c0_132], %282 {strides = array<i32>} : memref<8x8x128xbf16, #tpu.memory_space<vmem>>, vector<1x8x128xbf16>,
    %c0_133 = arith.constant 0 : index
    %c0_134 = arith.constant 0 : index
    %283 = vector.load %arg4[%c0_133, %c0_134] : memref<8x128xf32, #tpu.memory_space<vmem>>, vector<8x128xf32>
    %c0_135 = arith.constant 0 : index
    %c0_136 = arith.constant 0 : index
    %284 = vector.load %arg5[%c0_135, %c0_136] : memref<8x128xf32, #tpu.memory_space<vmem>>, vector<8x128xf32>
    %c7 = arith.constant 7 : index
    %c0_137 = arith.constant 0 : index
    %c0_138 = arith.constant 0 : index
    %285 = vector.load %arg1[%c7, %c0_137, %c0_138] : memref<8x8x512xbf16, #tpu.memory_space<vmem>>, vector<1x8x512xbf16>
    %286 = vector.shape_cast %285 : vector<1x8x512xbf16> to vector<8x512xbf16>
    %287 = arith.extf %286 : vector<8x512xbf16> to vector<8x512xf32>
    %288 = arith.truncf %283 : vector<8x128xf32> to vector<8x128xbf16>
    %c0_139 = arith.constant 0 : index
    %c0_140 = arith.constant 0 : index
    %289 = vector.load %arg2[%c0_139, %c0_140] : memref<128x512xbf16, #tpu.memory_space<vmem>>, vector<128x512xbf16>
    %cst_141 = arith.constant dense<0.000000e+00> : vector<8x512xf32>
    %290 = tpu.matmul %288, %289, %cst_141 {dimension_numbers = #tpu.dot_dimension_numbers<[1], [0], [0], [1], [0, 0, 1, 1], [], []>} : vector<8x128xbf16>, vector<128x512xbf16>, vector<8x512xf32> -> vector<8x512xf32>
    %291 = arith.addf %287, %290 : vector<8x512xf32>
    %292 = vector.extract_strided_slice %291 {offsets = [0, 0], sizes = [8, 128], strides = [1, 1]} : vector<8x512xf32> to vector<8x128xf32>
    %293 = arith.negf %292 : vector<8x128xf32>
    %294 = math.exp %293 : vector<8x128xf32>
    %cst_142 = arith.constant 1.000000e+00 : f32
    %295 = vector.broadcast %cst_142 : f32 to vector<8x128xf32>
    %296 = arith.addf %295, %294 : vector<8x128xf32>
    %297 = arith.divf %295, %296 : vector<8x128xf32>
    %298 = vector.extract_strided_slice %291 {offsets = [0, 128], sizes = [8, 128], strides = [1, 1]} : vector<8x512xf32> to vector<8x128xf32>
    %299 = arith.negf %298 : vector<8x128xf32>
    %300 = math.exp %299 : vector<8x128xf32>
    %cst_143 = arith.constant 1.000000e+00 : f32
    %301 = vector.broadcast %cst_143 : f32 to vector<8x128xf32>
    %302 = arith.addf %301, %300 : vector<8x128xf32>
    %303 = arith.divf %301, %302 : vector<8x128xf32>
    %304 = vector.extract_strided_slice %291 {offsets = [0, 256], sizes = [8, 128], strides = [1, 1]} : vector<8x512xf32> to vector<8x128xf32>
    %305 = math.tanh %304 : vector<8x128xf32>
    %306 = vector.extract_strided_slice %291 {offsets = [0, 384], sizes = [8, 128], strides = [1, 1]} : vector<8x512xf32> to vector<8x128xf32>
    %307 = arith.negf %306 : vector<8x128xf32>
    %308 = math.exp %307 : vector<8x128xf32>
    %cst_144 = arith.constant 1.000000e+00 : f32
    %309 = vector.broadcast %cst_144 : f32 to vector<8x128xf32>
    %310 = arith.addf %309, %308 : vector<8x128xf32>
    %311 = arith.divf %309, %310 : vector<8x128xf32>
    %312 = arith.mulf %303, %284 : vector<8x128xf32>
    %313 = arith.mulf %297, %305 : vector<8x128xf32>
    %314 = arith.addf %312, %313 : vector<8x128xf32>
    %315 = math.tanh %314 : vector<8x128xf32>
    %316 = arith.mulf %311, %315 : vector<8x128xf32>
    %c0_145 = arith.constant 0 : index
    %c0_146 = arith.constant 0 : index
    %317 = vector.load %arg5[%c0_145, %c0_146] : memref<8x128xf32, #tpu.memory_space<vmem>>, vector<8x128xf32>
    tpu.vector_store %arg5[%c0_145, %c0_146], %314 {strides = array<i32>} : memref<8x128xf32, #tpu.memory_space<vmem>>, vector<8x128xf32>,
    %c0_147 = arith.constant 0 : index
    %c0_148 = arith.constant 0 : index
    %318 = vector.load %arg4[%c0_147, %c0_148] : memref<8x128xf32, #tpu.memory_space<vmem>>, vector<8x128xf32>
    tpu.vector_store %arg4[%c0_147, %c0_148], %316 {strides = array<i32>} : memref<8x128xf32, #tpu.memory_space<vmem>>, vector<8x128xf32>,
    %319 = arith.truncf %316 : vector<8x128xf32> to vector<8x128xbf16>
    %c7_149 = arith.constant 7 : index
    %c0_150 = arith.constant 0 : index
    %c0_151 = arith.constant 0 : index
    %320 = vector.load %arg3[%c7_149, %c0_150, %c0_151] : memref<8x8x128xbf16, #tpu.memory_space<vmem>>, vector<1x8x128xbf16>
    %321 = vector.shape_cast %320 : vector<1x8x128xbf16> to vector<8x128xbf16>
    %322 = vector.shape_cast %319 : vector<8x128xbf16> to vector<1x8x128xbf16>
    tpu.vector_store %arg3[%c7_149, %c0_150, %c0_151], %322 {strides = array<i32>} : memref<8x8x128xbf16, #tpu.memory_space<vmem>>, vector<1x8x128xbf16>,
    return
  }
  func.func @transform_0(%arg0: i32) -> (i32, i32, i32) {
    %c0_i32 = arith.constant 0 : i32
    %c0_i32_0 = arith.constant 0 : i32
    %c0_i32_1 = arith.constant 0 : i32
    return %arg0, %c0_i32, %c0_i32_0 : i32, i32, i32
  }
  func.func @transform_1(%arg0: i32) -> (i32, i32) {
    %c0_i32 = arith.constant 0 : i32
    %c0_i32_0 = arith.constant 0 : i32
    %c0_i32_1 = arith.constant 0 : i32
    return %c0_i32, %c0_i32_0 : i32, i32
  }
  func.func @transform_2(%arg0: i32) -> (i32, i32, i32) {
    %c0_i32 = arith.constant 0 : i32
    %c0_i32_0 = arith.constant 0 : i32
    %c0_i32_1 = arith.constant 0 : i32
    return %arg0, %c0_i32, %c0_i32_0 : i32, i32, i32
  }
}

</mosaic_0001>

<bundles_post_ra>
// kernel: reclm_forward.13
= control target key start
LH: loop header
LB: loop body
LE: loop exit
PB: predicated region body
PF: predicated region fallthrough
CT: control target
= control target key end

     0   :  { %s464_s1 = inlined_call_operand.vmem [shape: bf16[128,128], index: 1, kind: input, shape index: {}]   ;;  %s465_s0 = inlined_call_operand.vmem [shape: bf16[128,128], index: 0, kind: input, shape index: {}]   ;;  %s466_s2 = inlined_call_operand.vmem [shape: f32[128,128], index: 2, kind: output, shape index: {}]  }
   0x1   :  { %v337_v0 = vld [vmem:[%s464_s1] sm:$0xff]   ;;  %v338_v1 = vld [vmem:[%s464_s1 + $0x8] sm:$0xff]   ;;  %v339_v2 = vld [vmem:[%s464_s1 + $0x10] sm:$0xff]  }
   0x2   :  { %289 = vmatprep.subr.bf16.mxu0 %v337_v0  ;;  %321 = vmatprep.subr.bf16.mxu1 %v337_v0  ;;  %v340_v3 = vld [vmem:[%s464_s1 + $0x18] sm:$0xff]   ;;  %v345_v4 = vld [vmem:[%s465_s0] sm:$0xff]   ;;  %v342_v7 = vld [vmem:[%s464_s1 + $0x28] sm:$0xff]  }
   0x3   :  { %290 = vmatpush3.bf16.msra.mxu0 %v337_v0  ;;  %329 = vmatpush3.bf16.msra.mxu1 %v337_v0  ;;  %v346_v5 = vld [vmem:[%s465_s0 + $0x20] sm:$0xff]   ;;  %v343_v8 = vld [vmem:[%s464_s1 + $0x30] sm:$0xff]   ;;  %v344_v9 = vld [vmem:[%s464_s1 + $0x38] sm:$0xff]  }
   0x4   :  { %291 = vmatprep.subr.bf16.mxu0 %v338_v1  ;;  %322 = vmatprep.subr.bf16.mxu1 %v338_v1  ;;  %v341_v6 = vld [vmem:[%s464_s1 + $0x20] sm:$0xff]   ;;  %v347_v10 = vld [vmem:[%s465_s0 + $0x8] sm:$0xff]   ;;  %v349_v12 = vld [vmem:[%s465_s0 + $0x10] sm:$0xff]  }
   0x5   :  { %305 = vmatprep.mubr.bf16.mxu0 %v345_v4  ;;  %313 = vmatprep.mubr.bf16.mxu1 %v346_v5  ;;  %v348_v11 = vld [vmem:[%s465_s0 + $0x28] sm:$0xff]   ;;  %v350_v13 = vld [vmem:[%s465_s0 + $0x30] sm:$0xff]   ;;  %v351_v14 = vld [vmem:[%s465_s0 + $0x18] sm:$0xff]  }
   0x6   :  { %v352_v15 = vld [vmem:[%s465_s0 + $0x38] sm:$0xff]  }
   0x7   :  { %292 = vmatpush3.bf16.msra.mxu0 %v338_v1  ;;  %330 = vmatpush3.bf16.msra.mxu1 %v338_v1 }
   0x8   :  { %293 = vmatprep.subr.bf16.mxu0 %v339_v2  ;;  %323 = vmatprep.subr.bf16.mxu1 %v339_v2 }
   0xb   :  { %294 = vmatpush3.bf16.msra.mxu0 %v339_v2  ;;  %331 = vmatpush3.bf16.msra.mxu1 %v339_v2 }
   0xc   :  { %295 = vmatprep.subr.bf16.mxu0 %v340_v3  ;;  %324 = vmatprep.subr.bf16.mxu1 %v340_v3 }
   0xf   :  { %296 = vmatpush3.bf16.msra.mxu0 %v340_v3  ;;  %332 = vmatpush3.bf16.msra.mxu1 %v340_v3 }
  0x10   :  { %297 = vmatprep.subr.bf16.mxu0 %v341_v6  ;;  %325 = vmatprep.subr.bf16.mxu1 %v341_v6 }
  0x13   :  { %298 = vmatpush3.bf16.msra.mxu0 %v341_v6  ;;  %333 = vmatpush3.bf16.msra.mxu1 %v341_v6 }
  0x14   :  { %299 = vmatprep.subr.bf16.mxu0 %v342_v7  ;;  %326 = vmatprep.subr.bf16.mxu1 %v342_v7 }
  0x17   :  { %300 = vmatpush3.bf16.msra.mxu0 %v342_v7  ;;  %334 = vmatpush3.bf16.msra.mxu1 %v342_v7 }
  0x18   :  { %301 = vmatprep.subr.bf16.mxu0 %v343_v8  ;;  %327 = vmatprep.subr.bf16.mxu1 %v343_v8 }
  0x1b   :  { %302 = vmatpush3.bf16.msra.mxu0 %v343_v8  ;;  %335 = vmatpush3.bf16.msra.mxu1 %v343_v8 }
  0x1c   :  { %303 = vmatprep.subr.bf16.mxu0 %v344_v9  ;;  %328 = vmatprep.subr.bf16.mxu1 %v344_v9 }
  0x1f   :  { %304 = vmatpush3.bf16.msra.mxu0 %v344_v9  ;;  %336 = vmatpush3.bf16.msra.mxu1 %v344_v9 }
  0x22   :  { %306 = vmatmul.mubr.bf16.vlgmr.msra.gmra.mrb[0].mxu0 %v347_v10  ;;  %314 = vmatmul.mubr.bf16.vlgmr.msra.gmra.mrb[0].mxu1 %v348_v11 }
  0x23   :  { %309 = vmatprep.mubr.bf16.mxu0 %v349_v12  ;;  %317 = vmatprep.mubr.bf16.mxu1 %v350_v13 }
  0x2a   :  { %310 = vmatmul.mubr.bf16.gmra.mrb[4].mxu0 %v351_v14  ;;  %318 = vmatmul.mubr.bf16.gmra.mrb[4].mxu1 %v352_v15 }
  0xf5   :  { %v307_v16 = vpop.f32.mrb[0].mxu0  ;;  %v315_v17 = vpop.f32.mrb[0].mxu1 }
  0xf6   :  { %239 = vst [vmem:[%s466_s2 + $0x10] sm:$0xff] %v307_v16  ;;  %247 = vst [vmem:[%s466_s2 + $0x50] sm:$0xff] %v315_v17  ;;  %v174_v18 = vpop.f32.mrb[1].mxu0  ;;  %v206_v19 = vpop.f32.mrb[1].mxu1 }
  0xf7   :  { %237 = vst [vmem:[%s466_s2] sm:$0xff] %v174_v18  ;;  %245 = vst [vmem:[%s466_s2 + $0x40] sm:$0xff] %v206_v19  ;;  %v308_v20 = vpop.f32.mrb[2].mxu0  ;;  %v316_v21 = vpop.f32.mrb[2].mxu1 }
  0xf8   :  { %240 = vst [vmem:[%s466_s2 + $0x18] sm:$0xff] %v308_v20  ;;  %248 = vst [vmem:[%s466_s2 + $0x58] sm:$0xff] %v316_v21  ;;  %v177_v22 = vpop.f32.mrb[3].mxu0  ;;  %v209_v23 = vpop.f32.mrb[3].mxu1 }
  0xf9   :  { %238 = vst [vmem:[%s466_s2 + $0x8] sm:$0xff] %v177_v22  ;;  %246 = vst [vmem:[%s466_s2 + $0x48] sm:$0xff] %v209_v23 }
  0xfd   :  { %v311_v24 = vpop.f32.mrb[4].mxu0  ;;  %v319_v25 = vpop.f32.mrb[4].mxu1 }
  0xfe   :  { %243 = vst [vmem:[%s466_s2 + $0x30] sm:$0xff] %v311_v24  ;;  %251 = vst [vmem:[%s466_s2 + $0x70] sm:$0xff] %v319_v25  ;;  %v190_v26 = vpop.f32.mrb[5].mxu0  ;;  %v222_v27 = vpop.f32.mrb[5].mxu1 }
  0xff   :  { %241 = vst [vmem:[%s466_s2 + $0x20] sm:$0xff] %v190_v26  ;;  %249 = vst [vmem:[%s466_s2 + $0x60] sm:$0xff] %v222_v27  ;;  %v312_v28 = vpop.f32.mrb[6].mxu0  ;;  %v320_v29 = vpop.f32.mrb[6].mxu1 }
 0x100   :  { %244 = vst [vmem:[%s466_s2 + $0x38] sm:$0xff] %v312_v28  ;;  %252 = vst [vmem:[%s466_s2 + $0x78] sm:$0xff] %v320_v29  ;;  %v193_v30 = vpop.f32.mrb[7].mxu0  ;;  %v225_v31 = vpop.f32.mrb[7].mxu1 }
 0x101   :  { %242 = vst [vmem:[%s466_s2 + $0x28] sm:$0xff] %v193_v30  ;;  %250 = vst [vmem:[%s466_s2 + $0x68] sm:$0xff] %v225_v31 }

// kernel: reclm_forward.7
= control target key start
LH: loop header
LB: loop body
LE: loop exit
PB: predicated region body
PF: predicated region fallthrough
CT: control target
= control target key end

     0   :  { %v908_v1 = vmov 0   ;;  %v65_v41 = vlaneseq  ;;  %s1236_s1 = inlined_call_operand.vmem [shape: bf16[128,512], index: 1, kind: input, shape index: {}]   ;;  %s1237_s0 = inlined_call_operand.vmem [shape: bf16[128,128], index: 0, kind: input, shape index: {}]   ;;  %s1238_s2 = inlined_call_operand.vmem [shape: f32[1,512], index: 2, kind: input, shape index: {}]   ;;  %s1239_s3 = inlined_call_operand.vmem [shape: bf16[128,512], index: 3, kind: output, shape index: {}]  }
   0x1   :  { %v852_v0 = vld [vmem:[%s1236_s1 + $0x4] ss:$16 sps:$4 sm:$0xff]   ;;  %325 = vmatprep.mubr.bf16.mxu0 %v908_v1  ;;  %438 = vmatprep.mubr.bf16.mxu1 %v908_v1  ;;  %v854_v2 = vld [vmem:[%s1236_s1 + $0xc] ss:$16 sps:$4 sm:$0xff]   ;;  %v856_v3 = vld [vmem:[%s1236_s1] ss:$16 sps:$4 sm:$0xff]  }
   0x2   :  { %293 = vmatprep.subr.bf16.mxu0 %v852_v0  ;;  %v857_v4 = vld [vmem:[%s1236_s1 + $0x8] ss:$16 sps:$4 sm:$0xff]   ;;  %406 = vmatprep.subr.bf16.mxu1 %v854_v2  ;;  %v858_v5 = vld [vmem:[%s1236_s1 + $0x24] ss:$16 sps:$4 sm:$0xff]   ;;  %v860_v6 = vld [vmem:[%s1236_s1 + $0x2c] ss:$16 sps:$4 sm:$0xff]  }
   0x3   :  { %294 = vmatpush1.bf16.msra.mxu0 %v856_v3  ;;  %407 = vmatpush1.bf16.msra.mxu1 %v857_v4  ;;  %v862_v7 = vld [vmem:[%s1236_s1 + $0x20] ss:$16 sps:$4 sm:$0xff]   ;;  %v863_v8 = vld [vmem:[%s1236_s1 + $0x28] ss:$16 sps:$4 sm:$0xff]   ;;  %v864_v9 = vld [vmem:[%s1236_s1 + $0x44] ss:$16 sps:$4 sm:$0xff]  }
   0x4   :  { %295 = vmatprep.subr.bf16.mxu0 %v858_v5  ;;  %408 = vmatprep.subr.bf16.mxu1 %v860_v6  ;;  %v866_v10 = vld [vmem:[%s1236_s1 + $0x4c] ss:$16 sps:$4 sm:$0xff]   ;;  %v868_v11 = vld [vmem:[%s1236_s1 + $0x40] ss:$16 sps:$4 sm:$0xff]   ;;  %v869_v12 = vld [vmem:[%s1236_s1 + $0x48] ss:$16 sps:$4 sm:$0xff]  }
   0x5   :  { %v870_v13 = vld [vmem:[%s1236_s1 + $0x64] ss:$16 sps:$4 sm:$0xff]   ;;  %v872_v14 = vld [vmem:[%s1236_s1 + $0x6c] ss:$16 sps:$4 sm:$0xff]   ;;  %v874_v15 = vld [vmem:[%s1236_s1 + $0x60] ss:$16 sps:$4 sm:$0xff]  }
   0x6   :  { %v875_v16 = vld [vmem:[%s1236_s1 + $0x68] ss:$16 sps:$4 sm:$0xff]   ;;  %v876_v17 = vld [vmem:[%s1236_s1 + $0x84] ss:$16 sps:$4 sm:$0xff]   ;;  %v878_v18 = vld [vmem:[%s1236_s1 + $0x8c] ss:$16 sps:$4 sm:$0xff]  }
   0x7   :  { %296 = vmatpush1.bf16.msra.mxu0 %v862_v7  ;;  %409 = vmatpush1.bf16.msra.mxu1 %v863_v8  ;;  %v880_v19 = vld [vmem:[%s1236_s1 + $0x80] ss:$16 sps:$4 sm:$0xff]   ;;  %v881_v20 = vld [vmem:[%s1236_s1 + $0x88] ss:$16 sps:$4 sm:$0xff]   ;;  %v882_v21 = vld [vmem:[%s1236_s1 + $0xa4] ss:$16 sps:$4 sm:$0xff]  }
   0x8   :  { %297 = vmatprep.subr.bf16.mxu0 %v864_v9  ;;  %410 = vmatprep.subr.bf16.mxu1 %v866_v10  ;;  %v884_v22 = vld [vmem:[%s1236_s1 + $0xac] ss:$16 sps:$4 sm:$0xff]   ;;  %v886_v23 = vld [vmem:[%s1236_s1 + $0xa0] ss:$16 sps:$4 sm:$0xff]   ;;  %v887_v24 = vld [vmem:[%s1236_s1 + $0xa8] ss:$16 sps:$4 sm:$0xff]  }
   0x9   :  { %v888_v25 = vld [vmem:[%s1236_s1 + $0xc4] ss:$16 sps:$4 sm:$0xff]   ;;  %v890_v26 = vld [vmem:[%s1236_s1 + $0xcc] ss:$16 sps:$4 sm:$0xff]   ;;  %v892_v27 = vld [vmem:[%s1236_s1 + $0xc0] ss:$16 sps:$4 sm:$0xff]  }
   0xa   :  { %v893_v28 = vld [vmem:[%s1236_s1 + $0xc8] ss:$16 sps:$4 sm:$0xff]   ;;  %v894_v29 = vld [vmem:[%s1236_s1 + $0xe4] ss:$16 sps:$4 sm:$0xff]   ;;  %v896_v30 = vld [vmem:[%s1236_s1 + $0xec] ss:$16 sps:$4 sm:$0xff]  }
   0xb   :  { %298 = vmatpush1.bf16.msra.mxu0 %v868_v11  ;;  %411 = vmatpush1.bf16.msra.mxu1 %v869_v12  ;;  %v898_v31 = vld [vmem:[%s1236_s1 + $0xe0] ss:$16 sps:$4 sm:$0xff]   ;;  %v899_v32 = vld [vmem:[%s1236_s1 + $0xe8] ss:$16 sps:$4 sm:$0xff]   ;;  %v66_v42 = vshrl.u32 %v65_v41, 7 }
   0xc   :  { %299 = vmatprep.subr.bf16.mxu0 %v870_v13  ;;  %412 = vmatprep.subr.bf16.mxu1 %v872_v14  ;;  %v900_v33 = vld [vmem:[%s1237_s0] sm:$0xff]   ;;  %v901_v34 = vld [vmem:[%s1237_s0 + $0x8] sm:$0xff]   ;;  %v902_v35 = vld [vmem:[%s1237_s0 + $0x10] sm:$0xff]  }
   0xd   :  { %v903_v36 = vld [vmem:[%s1237_s0 + $0x18] sm:$0xff]   ;;  %v904_v37 = vld [vmem:[%s1237_s0 + $0x20] sm:$0xff]   ;;  %v905_v38 = vld [vmem:[%s1237_s0 + $0x28] sm:$0xff]   ;;  %v67_v43 = vsub.s32 0, %v66_v42  ;;  %v75_v44 = vsub.s32 2, %v66_v42  ;;  %v71_v46 = vsub.s32 1, %v66_v42 }
   0xe   :  { %v906_v39 = vld [vmem:[%s1237_s0 + $0x30] sm:$0xff]   ;;  %v907_v40 = vld [vmem:[%s1237_s0 + $0x38] sm:$0xff]   ;;  %v63_v45 = vld [vmem:[%s1238_s2] sm:$0xf]  ;;  %v79_v47 = vsub.s32 3, %v66_v42 }
   0xf   :  { %300 = vmatpush1.bf16.msra.mxu0 %v874_v15  ;;  %413 = vmatpush1.bf16.msra.mxu1 %v875_v16  ;;  %v1068_v48 = vrot.slane %v63_v45, %v67_v43  ;;  %v1070_v49 = vrot.slane %v63_v45, %v75_v44  ;;  %v1072_v50 = vrot.slane %v63_v45, %v71_v46 }
  0x10   :  { %301 = vmatprep.subr.bf16.mxu0 %v876_v17  ;;  %414 = vmatprep.subr.bf16.mxu1 %v878_v18  ;;  %v1074_v51 = vrot.slane %v63_v45, %v79_v47 }
  0x13   :  { %302 = vmatpush1.bf16.msra.mxu0 %v880_v19  ;;  %415 = vmatpush1.bf16.msra.mxu1 %v881_v20 }
  0x14   :  { %303 = vmatprep.subr.bf16.mxu0 %v882_v21  ;;  %416 = vmatprep.subr.bf16.mxu1 %v884_v22 }
  0x17   :  { %304 = vmatpush1.bf16.msra.mxu0 %v886_v23  ;;  %417 = vmatpush1.bf16.msra.mxu1 %v887_v24 }
  0x18   :  { %305 = vmatprep.subr.bf16.mxu0 %v888_v25  ;;  %418 = vmatprep.subr.bf16.mxu1 %v890_v26 }
  0x1b   :  { %306 = vmatpush1.bf16.msra.mxu0 %v892_v27  ;;  %419 = vmatpush1.bf16.msra.mxu1 %v893_v28 }
  0x1c   :  { %307 = vmatprep.subr.bf16.mxu0 %v894_v29  ;;  %420 = vmatprep.subr.bf16.mxu1 %v896_v30 }
  0x1f   :  { %308 = vmatpush1.bf16.msra.mxu0 %v898_v31  ;;  %421 = vmatpush1.bf16.msra.mxu1 %v899_v32 }
  0x22   :  { %326 = vmatmul.mubr.bf16.vlgmr.msra.gmra.mrb[0].mxu0 %v900_v33  ;;  %439 = vmatmul.mubr.bf16.vlgmr.msra.gmra.mrb[0].mxu1 %v900_v33 }
  0x23   :  { %335 = vmatprep.mubr.bf16.mxu0 %v908_v1  ;;  %448 = vmatprep.mubr.bf16.mxu1 %v908_v1 }
  0x2a   :  { %336 = vmatmul.mubr.bf16.gmra.mrb[4].mxu0 %v901_v34  ;;  %449 = vmatmul.mubr.bf16.gmra.mrb[4].mxu1 %v901_v34 }
  0x2b   :  { %345 = vmatprep.mubr.bf16.mxu0 %v908_v1  ;;  %458 = vmatprep.mubr.bf16.mxu1 %v908_v1 }
  0x32   :  { %346 = vmatmul.mubr.bf16.gmra.mrb[8].mxu0 %v902_v35  ;;  %459 = vmatmul.mubr.bf16.gmra.mrb[8].mxu1 %v902_v35 }
  0x33   :  { %355 = vmatprep.mubr.bf16.mxu0 %v908_v1  ;;  %468 = vmatprep.mubr.bf16.mxu1 %v908_v1 }
  0x3a   :  { %356 = vmatmul.mubr.bf16.gmra.mrb[12].mxu0 %v903_v36  ;;  %469 = vmatmul.mubr.bf16.gmra.mrb[12].mxu1 %v903_v36 }
  0x3b   :  { %365 = vmatprep.mubr.bf16.mxu0 %v908_v1  ;;  %478 = vmatprep.mubr.bf16.mxu1 %v908_v1 }
  0x42   :  { %366 = vmatmul.mubr.bf16.gmra.mrb[16].mxu0 %v904_v37  ;;  %479 = vmatmul.mubr.bf16.gmra.mrb[16].mxu1 %v904_v37 }
  0x43   :  { %375 = vmatprep.mubr.bf16.mxu0 %v908_v1  ;;  %488 = vmatprep.mubr.bf16.mxu1 %v908_v1 }
  0x4a   :  { %376 = vmatmul.mubr.bf16.gmra.mrb[20].mxu0 %v905_v38  ;;  %489 = vmatmul.mubr.bf16.gmra.mrb[20].mxu1 %v905_v38 }
  0x4b   :  { %385 = vmatprep.mubr.bf16.mxu0 %v908_v1  ;;  %498 = vmatprep.mubr.bf16.mxu1 %v908_v1 }
  0x52   :  { %386 = vmatmul.mubr.bf16.gmra.mrb[24].mxu0 %v906_v39  ;;  %499 = vmatmul.mubr.bf16.gmra.mrb[24].mxu1 %v906_v39 }
  0x53   :  { %395 = vmatprep.mubr.bf16.mxu0 %v908_v1  ;;  %508 = vmatprep.mubr.bf16.mxu1 %v908_v1 }
  0x5a   :  { %396 = vmatmul.mubr.bf16.gmra.mrb[28].mxu0 %v907_v40  ;;  %509 = vmatmul.mubr.bf16.gmra.mrb[28].mxu1 %v907_v40 }
  0xf5   :  { %v327_v52 = vpop.f32.mrb[0].mxu0  ;;  %v440_v53 = vpop.f32.mrb[0].mxu1 }
  0xf6   :  { %v328_v54 = vadd.f32 %v327_v52, %v1068_v48  ;;  %v441_v55 = vadd.f32 %v440_v53, %v1070_v49  ;;  %v329_v56 = vpop.f32.mrb[1].mxu0  ;;  %v442_v57 = vpop.f32.mrb[1].mxu1 }
  0xf7   :  { %v330_v58 = vadd.f32 %v329_v56, %v1072_v50  ;;  %v443_v59 = vadd.f32 %v442_v57, %v1074_v51  ;;  %v331_v60 = vpop.f32.mrb[2].mxu0  ;;  %v444_v61 = vpop.f32.mrb[2].mxu1 }
  0xf8   :  { %v332_v62 = vadd.f32 %v331_v60, %v1068_v48  ;;  %v445_v63 = vadd.f32 %v444_v61, %v1070_v49  ;;  %v333_v0 = vpop.f32.mrb[3].mxu0  ;;  %v446_v1 = vpop.f32.mrb[3].mxu1 }
  0xf9   :  { %v819_v2 = vpack.c.bf16 %v330_v58, %v328_v54  ;;  %v820_v3 = vpack.c.bf16 %v443_v59, %v441_v55  ;;  %v334_v4 = vadd.f32 %v333_v0, %v1072_v50  ;;  %v447_v5 = vadd.f32 %v446_v1, %v1074_v51 }
  0xfb   :  { %711 = vst [vmem:[%s1239_s3] sm:$0xff] %v819_v2  ;;  %712 = vst [vmem:[%s1239_s3 + $0x8] sm:$0xff] %v820_v3  ;;  %v821_v6 = vpack.c.bf16 %v334_v4, %v332_v62  ;;  %v822_v7 = vpack.c.bf16 %v447_v5, %v445_v63 }
  0xfd   :  { %713 = vst [vmem:[%s1239_s3 + $0x10] sm:$0xff] %v821_v6  ;;  %714 = vst [vmem:[%s1239_s3 + $0x18] sm:$0xff] %v822_v7  ;;  %v337_v8 = vpop.f32.mrb[4].mxu0  ;;  %v450_v9 = vpop.f32.mrb[4].mxu1 }
  0xfe   :  { %v338_v10 = vadd.f32 %v337_v8, %v1068_v48  ;;  %v451_v11 = vadd.f32 %v450_v9, %v1070_v49  ;;  %v339_v12 = vpop.f32.mrb[5].mxu0  ;;  %v452_v13 = vpop.f32.mrb[5].mxu1 }
  0xff   :  { %v340_v14 = vadd.f32 %v339_v12, %v1072_v50  ;;  %v453_v15 = vadd.f32 %v452_v13, %v1074_v51  ;;  %v341_v16 = vpop.f32.mrb[6].mxu0  ;;  %v454_v17 = vpop.f32.mrb[6].mxu1 }
 0x100   :  { %v342_v18 = vadd.f32 %v341_v16, %v1068_v48  ;;  %v455_v19 = vadd.f32 %v454_v17, %v1070_v49  ;;  %v343_v20 = vpop.f32.mrb[7].mxu0  ;;  %v456_v21 = vpop.f32.mrb[7].mxu1 }
 0x101   :  { %v823_v22 = vpack.c.bf16 %v340_v14, %v338_v10  ;;  %v824_v23 = vpack.c.bf16 %v453_v15, %v451_v11  ;;  %v344_v24 = vadd.f32 %v343_v20, %v1072_v50  ;;  %v457_v25 = vadd.f32 %v456_v21, %v1074_v51 }
 0x103   :  { %715 = vst [vmem:[%s1239_s3 + $0x20] sm:$0xff] %v823_v22  ;;  %716 = vst [vmem:[%s1239_s3 + $0x28] sm:$0xff] %v824_v23  ;;  %v825_v26 = vpack.c.bf16 %v344_v24, %v342_v18  ;;  %v826_v27 = vpack.c.bf16 %v457_v25, %v455_v19 }
 0x105   :  { %717 = vst [vmem:[%s1239_s3 + $0x30] sm:$0xff] %v825_v26  ;;  %718 = vst [vmem:[%s1239_s3 + $0x38] sm:$0xff] %v826_v27  ;;  %v347_v28 = vpop.f32.mrb[8].mxu0  ;;  %v460_v29 = vpop.f32.mrb[8].mxu1 }
 0x106   :  { %v348_v30 = vadd.f32 %v347_v28, %v1068_v48  ;;  %v461_v31 = vadd.f32 %v460_v29, %v1070_v49  ;;  %v349_v32 = vpop.f32.mrb[9].mxu0  ;;  %v462_v33 = vpop.f32.mrb[9].mxu1 }
 0x107   :  { %v350_v34 = vadd.f32 %v349_v32, %v1072_v50  ;;  %v463_v35 = vadd.f32 %v462_v33, %v1074_v51  ;;  %v351_v36 = vpop.f32.mrb[10].mxu0  ;;  %v464_v37 = vpop.f32.mrb[10].mxu1 }
 0x108   :  { %v352_v38 = vadd.f32 %v351_v36, %v1068_v48  ;;  %v465_v39 = vadd.f32 %v464_v37, %v1070_v49  ;;  %v353_v40 = vpop.f32.mrb[11].mxu0  ;;  %v466_v41 = vpop.f32.mrb[11].mxu1 }
 0x109   :  { %v827_v42 = vpack.c.bf16 %v350_v34, %v348_v30  ;;  %v828_v43 = vpack.c.bf16 %v463_v35, %v461_v31  ;;  %v354_v44 = vadd.f32 %v353_v40, %v1072_v50  ;;  %v467_v45 = vadd.f32 %v466_v41, %v1074_v51 }
 0x10b   :  { %719 = vst [vmem:[%s1239_s3 + $0x40] sm:$0xff] %v827_v42  ;;  %720 = vst [vmem:[%s1239_s3 + $0x48] sm:$0xff] %v828_v43  ;;  %v829_v46 = vpack.c.bf16 %v354_v44, %v352_v38  ;;  %v830_v47 = vpack.c.bf16 %v467_v45, %v465_v39 }
 0x10d   :  { %721 = vst [vmem:[%s1239_s3 + $0x50] sm:$0xff] %v829_v46  ;;  %722 = vst [vmem:[%s1239_s3 + $0x58] sm:$0xff] %v830_v47  ;;  %v357_v52 = vpop.f32.mrb[12].mxu0  ;;  %v470_v53 = vpop.f32.mrb[12].mxu1 }
 0x10e   :  { %v358_v54 = vadd.f32 %v357_v52, %v1068_v48  ;;  %v471_v55 = vadd.f32 %v470_v53, %v1070_v49  ;;  %v359_v56 = vpop.f32.mrb[13].mxu0  ;;  %v472_v57 = vpop.f32.mrb[13].mxu1 }
 0x10f   :  { %v360_v58 = vadd.f32 %v359_v56, %v1072_v50  ;;  %v473_v59 = vadd.f32 %v472_v57, %v1074_v51  ;;  %v361_v60 = vpop.f32.mrb[14].mxu0  ;;  %v474_v61 = vpop.f32.mrb[14].mxu1 }
 0x110   :  { %v362_v62 = vadd.f32 %v361_v60, %v1068_v48  ;;  %v475_v63 = vadd.f32 %v474_v61, %v1070_v49  ;;  %v363_v0 = vpop.f32.mrb[15].mxu0  ;;  %v476_v1 = vpop.f32.mrb[15].mxu1 }
 0x111   :  { %v831_v2 = vpack.c.bf16 %v360_v58, %v358_v54  ;;  %v832_v3 = vpack.c.bf16 %v473_v59, %v471_v55  ;;  %v364_v4 = vadd.f32 %v363_v0, %v1072_v50  ;;  %v477_v5 = vadd.f32 %v476_v1, %v1074_v51 }
 0x113   :  { %723 = vst [vmem:[%s1239_s3 + $0x60] sm:$0xff] %v831_v2  ;;  %724 = vst [vmem:[%s1239_s3 + $0x68] sm:$0xff] %v832_v3  ;;  %v833_v6 = vpack.c.bf16 %v364_v4, %v362_v62  ;;  %v834_v7 = vpack.c.bf16 %v477_v5, %v475_v63 }
 0x115   :  { %725 = vst [vmem:[%s1239_s3 + $0x70] sm:$0xff] %v833_v6  ;;  %726 = vst [vmem:[%s1239_s3 + $0x78] sm:$0xff] %v834_v7  ;;  %v367_v8 = vpop.f32.mrb[16].mxu0  ;;  %v480_v9 = vpop.f32.mrb[16].mxu1 }
 0x116   :  { %v368_v10 = vadd.f32 %v367_v8, %v1068_v48  ;;  %v481_v11 = vadd.f32 %v480_v9, %v1070_v49  ;;  %v369_v12 = vpop.f32.mrb[17].mxu0  ;;  %v482_v13 = vpop.f32.mrb[17].mxu1 }
 0x117   :  { %v370_v14 = vadd.f32 %v369_v12, %v1072_v50  ;;  %v483_v15 = vadd.f32 %v482_v13, %v1074_v51  ;;  %v371_v16 = vpop.f32.mrb[18].mxu0  ;;  %v484_v17 = vpop.f32.mrb[18].mxu1 }
 0x118   :  { %v372_v18 = vadd.f32 %v371_v16, %v1068_v48  ;;  %v485_v19 = vadd.f32 %v484_v17, %v1070_v49  ;;  %v373_v20 = vpop.f32.mrb[19].mxu0  ;;  %v486_v21 = vpop.f32.mrb[19].mxu1 }
 0x119   :  { %v835_v22 = vpack.c.bf16 %v370_v14, %v368_v10  ;;  %v836_v23 = vpack.c.bf16 %v483_v15, %v481_v11  ;;  %v374_v24 = vadd.f32 %v373_v20, %v1072_v50  ;;  %v487_v25 = vadd.f32 %v486_v21, %v1074_v51 }
 0x11b   :  { %727 = vst [vmem:[%s1239_s3 + $0x80] sm:$0xff] %v835_v22  ;;  %728 = vst [vmem:[%s1239_s3 + $0x88] sm:$0xff] %v836_v23  ;;  %v837_v26 = vpack.c.bf16 %v374_v24, %v372_v18  ;;  %v838_v27 = vpack.c.bf16 %v487_v25, %v485_v19 }
 0x11d   :  { %729 = vst [vmem:[%s1239_s3 + $0x90] sm:$0xff] %v837_v26  ;;  %730 = vst [vmem:[%s1239_s3 + $0x98] sm:$0xff] %v838_v27  ;;  %v377_v28 = vpop.f32.mrb[20].mxu0  ;;  %v490_v29 = vpop.f32.mrb[20].mxu1 }
 0x11e   :  { %v378_v30 = vadd.f32 %v377_v28, %v1068_v48  ;;  %v491_v31 = vadd.f32 %v490_v29, %v1070_v49  ;;  %v379_v32 = vpop.f32.mrb[21].mxu0  ;;  %v492_v33 = vpop.f32.mrb[21].mxu1 }
 0x11f   :  { %v380_v34 = vadd.f32 %v379_v32, %v1072_v50  ;;  %v493_v35 = vadd.f32 %v492_v33, %v1074_v51  ;;  %v381_v36 = vpop.f32.mrb[22].mxu0  ;;  %v494_v37 = vpop.f32.mrb[22].mxu1 }
 0x120   :  { %v382_v38 = vadd.f32 %v381_v36, %v1068_v48  ;;  %v495_v39 = vadd.f32 %v494_v37, %v1070_v49  ;;  %v383_v40 = vpop.f32.mrb[23].mxu0  ;;  %v496_v41 = vpop.f32.mrb[23].mxu1 }
 0x121   :  { %v839_v42 = vpack.c.bf16 %v380_v34, %v378_v30  ;;  %v840_v43 = vpack.c.bf16 %v493_v35, %v491_v31  ;;  %v384_v44 = vadd.f32 %v383_v40, %v1072_v50  ;;  %v497_v45 = vadd.f32 %v496_v41, %v1074_v51 }
 0x123   :  { %731 = vst [vmem:[%s1239_s3 + $0xa0] sm:$0xff] %v839_v42  ;;  %732 = vst [vmem:[%s1239_s3 + $0xa8] sm:$0xff] %v840_v43  ;;  %v841_v46 = vpack.c.bf16 %v384_v44, %v382_v38  ;;  %v842_v47 = vpack.c.bf16 %v497_v45, %v495_v39 }
 0x125   :  { %733 = vst [vmem:[%s1239_s3 + $0xb0] sm:$0xff] %v841_v46  ;;  %734 = vst [vmem:[%s1239_s3 + $0xb8] sm:$0xff] %v842_v47  ;;  %v387_v52 = vpop.f32.mrb[24].mxu0  ;;  %v500_v53 = vpop.f32.mrb[24].mxu1 }
 0x126   :  { %v388_v54 = vadd.f32 %v387_v52, %v1068_v48  ;;  %v501_v55 = vadd.f32 %v500_v53, %v1070_v49  ;;  %v389_v56 = vpop.f32.mrb[25].mxu0  ;;  %v502_v57 = vpop.f32.mrb[25].mxu1 }
 0x127   :  { %v390_v58 = vadd.f32 %v389_v56, %v1072_v50  ;;  %v503_v59 = vadd.f32 %v502_v57, %v1074_v51  ;;  %v391_v60 = vpop.f32.mrb[26].mxu0  ;;  %v504_v61 = vpop.f32.mrb[26].mxu1 }
 0x128   :  { %v392_v62 = vadd.f32 %v391_v60, %v1068_v48  ;;  %v505_v63 = vadd.f32 %v504_v61, %v1070_v49  ;;  %v393_v0 = vpop.f32.mrb[27].mxu0  ;;  %v506_v1 = vpop.f32.mrb[27].mxu1 }
 0x129   :  { %v843_v2 = vpack.c.bf16 %v390_v58, %v388_v54  ;;  %v844_v3 = vpack.c.bf16 %v503_v59, %v501_v55  ;;  %v394_v4 = vadd.f32 %v393_v0, %v1072_v50  ;;  %v507_v5 = vadd.f32 %v506_v1, %v1074_v51 }
 0x12b   :  { %735 = vst [vmem:[%s1239_s3 + $0xc0] sm:$0xff] %v843_v2  ;;  %736 = vst [vmem:[%s1239_s3 + $0xc8] sm:$0xff] %v844_v3  ;;  %v845_v6 = vpack.c.bf16 %v394_v4, %v392_v62  ;;  %v846_v7 = vpack.c.bf16 %v507_v5, %v505_v63 }
 0x12d   :  { %737 = vst [vmem:[%s1239_s3 + $0xd0] sm:$0xff] %v845_v6  ;;  %738 = vst [vmem:[%s1239_s3 + $0xd8] sm:$0xff] %v846_v7  ;;  %v397_v8 = vpop.f32.mrb[28].mxu0  ;;  %v510_v9 = vpop.f32.mrb[28].mxu1 }
 0x12e   :  { %v398_v10 = vadd.f32 %v397_v8, %v1068_v48  ;;  %v511_v11 = vadd.f32 %v510_v9, %v1070_v49  ;;  %v399_v12 = vpop.f32.mrb[29].mxu0  ;;  %v512_v13 = vpop.f32.mrb[29].mxu1 }
 0x12f   :  { %v400_v14 = vadd.f32 %v399_v12, %v1072_v50  ;;  %v513_v15 = vadd.f32 %v512_v13, %v1074_v51  ;;  %v401_v16 = vpop.f32.mrb[30].mxu0  ;;  %v514_v17 = vpop.f32.mrb[30].mxu1 }
 0x130   :  { %v402_v18 = vadd.f32 %v401_v16, %v1068_v48  ;;  %v515_v19 = vadd.f32 %v514_v17, %v1070_v49  ;;  %v403_v20 = vpop.f32.mrb[31].mxu0  ;;  %v516_v21 = vpop.f32.mrb[31].mxu1 }
 0x131   :  { %v847_v22 = vpack.c.bf16 %v400_v14, %v398_v10  ;;  %v848_v23 = vpack.c.bf16 %v513_v15, %v511_v11  ;;  %v404_v24 = vadd.f32 %v403_v20, %v1072_v50  ;;  %v517_v25 = vadd.f32 %v516_v21, %v1074_v51 }
 0x133   :  { %739 = vst [vmem:[%s1239_s3 + $0xe0] sm:$0xff] %v847_v22  ;;  %740 = vst [vmem:[%s1239_s3 + $0xe8] sm:$0xff] %v848_v23  ;;  %v849_v26 = vpack.c.bf16 %v404_v24, %v402_v18  ;;  %v850_v48 = vpack.c.bf16 %v517_v25, %v515_v19 }
 0x135   :  { %741 = vst [vmem:[%s1239_s3 + $0xf0] sm:$0xff] %v849_v26  ;;  %742 = vst [vmem:[%s1239_s3 + $0xf8] sm:$0xff] %v850_v48 }

// kernel: reclm_forward.8
= control target key start
LH: loop header
LB: loop body
LE: loop exit
PB: predicated region body
PF: predicated region fallthrough
CT: control target
= control target key end

     0   :  { %s3321_s9 = smov 0   ;;  %s3982_s0 = inlined_call_operand.vmem [shape: bf16[16,8,512], index: 0, kind: input, shape index: {}]   ;;  %s3983_s1 = inlined_call_operand.vmem [shape: bf16[128,512], index: 1, kind: input, shape index: {}]   ;;  %s3984_s2 = inlined_call_operand.vmem [shape: bf16[16,8,128], index: 2, kind: output, shape index: {}]  }
   0x1 LB: > { %s2747_s10 = sadd.s32 4294967295, %s3302_s9   ;;  %p2751_p0 = scmp.ge.s32.totalorder %s3302_s9, 1  ;;  %s3302_s9 = sphi %s3321_s9, %s12_s9  }
   0x2   : > { %p114_p1 = scmp.lt.s32.totalorder %s3302_s9, 3 }
   0x4   : > { %p115_p2 = pnand %p2751_p0, %p114_p1 }
   0x5   : > { %s2752_s11 = sshll.u32 (!%p115_p2), %s2747_s10, 3  ;;  %p2757_p4 = scmp.ne.s32.totalorder (!%p115_p2), %s2747_s10, 0 }
   0x6   : > { %118 = sbr.rel (%p115_p2) target bundleno = 2135 (0x857), region = 28  ;;  %p138_p3 = scmp.lt.s32.totalorder (!%p115_p2), %s2752_s11, 15 }
   0xd   : > { %s3986_s11 = smov (!%p138_p3, %s2752_s11), 15  ;;  %154 = sbr.rel (%p2757_p4) target bundleno = 20 (0x14), region = 32 }
   0xe   : > { %s3061_s12 = sshll.u32 %s3986_s11, 4  ;;  %s2756_s13 = sshll.u32 %s3986_s11, 2  ;;  %v3304_v0 = vmov (!%p2757_p4), 0.0  }
   0xf   : > { %s3332_s16 = scalar_lea.vmem %s3982_s0, %s3061_s12  ;;  %s3337_s19 = scalar_lea.vmem %s3984_s2, %s2756_s13  ;;  %155 = vst [vmem:[#allocation2] sm:$0xff] (!%p2757_p4), %v3304_v0  ;;  %156 = vst [vmem:[#allocation3] sm:$0xff] (!%p2757_p4), %v3304_v0 }
  0x14 PF: > { %v3342_v1 = vld [vmem:[%s3983_s1 + $0x4] ss:$16 sps:$4 sm:$0xff]   ;;  %v3347_v2 = vld [vmem:[%s3983_s1] ss:$16 sps:$4 sm:$0xff]   ;;  %v3305_v3 = vmov 0   ;;  %v160_v40 = vld [vmem:[%s3332_s16 + $0x8] sm:$0xff] }
  0x15   : > { %390 = vmatprep.mubr.bf16.mxu0 %v3305_v3  ;;  %431 = vmatprep.mubr.bf16.mxu1 %v3305_v3  ;;  %v3355_v4 = vld [vmem:[%s3983_s1 + $0x24] ss:$16 sps:$4 sm:$0xff]   ;;  %v3361_v5 = vld [vmem:[%s3983_s1 + $0x20] ss:$16 sps:$4 sm:$0xff]   ;;  %v3372_v7 = vld [vmem:[%s3983_s1 + $0xc] ss:$16 sps:$4 sm:$0xff]   ;;  %v164_v47 = vunpack.c.h.bf16 %v160_v40  ;;  %v163_v53 = vunpack.c.l.bf16 %v160_v40 }
  0x16   : > { %358 = vmatprep.subr.bf16.mxu0 %v3342_v1  ;;  %v3367_v6 = vld [vmem:[%s3983_s1 + $0x44] ss:$16 sps:$4 sm:$0xff]   ;;  %v3377_v8 = vld [vmem:[%s3983_s1 + $0x8] ss:$16 sps:$4 sm:$0xff]   ;;  %v3383_v9 = vld [vmem:[%s3983_s1 + $0x40] ss:$16 sps:$4 sm:$0xff]   ;;  %399 = vmatprep.subr.bf16.mxu1 %v3372_v7 }
  0x17   : > { %359 = vmatpush1.bf16.msra.mxu0 %v3347_v2  ;;  %v3390_v10 = vld [vmem:[%s3983_s1 + $0x64] ss:$16 sps:$4 sm:$0xff]   ;;  %400 = vmatpush1.bf16.msra.mxu1 %v3377_v8  ;;  %v3396_v11 = vld [vmem:[%s3983_s1 + $0x2c] ss:$16 sps:$4 sm:$0xff]   ;;  %v3401_v12 = vld [vmem:[%s3983_s1 + $0x28] ss:$16 sps:$4 sm:$0xff]  }
  0x18   : > { %360 = vmatprep.subr.bf16.mxu0 %v3355_v4  ;;  %401 = vmatprep.subr.bf16.mxu1 %v3396_v11  ;;  %v3408_v13 = vld [vmem:[%s3983_s1 + $0x60] ss:$16 sps:$4 sm:$0xff]   ;;  %v3413_v14 = vld [vmem:[%s3983_s1 + $0x84] ss:$16 sps:$4 sm:$0xff]   ;;  %v3418_v15 = vld [vmem:[%s3983_s1 + $0x4c] ss:$16 sps:$4 sm:$0xff]  }
  0x19   : > { %v3425_v16 = vld [vmem:[%s3983_s1 + $0x48] ss:$16 sps:$4 sm:$0xff]   ;;  %v3431_v17 = vld [vmem:[%s3983_s1 + $0x6c] ss:$16 sps:$4 sm:$0xff]   ;;  %v3437_v18 = vld [vmem:[%s3983_s1 + $0x80] ss:$16 sps:$4 sm:$0xff]  }
  0x1a   : > { %v3443_v19 = vld [vmem:[%s3983_s1 + $0xa4] ss:$16 sps:$4 sm:$0xff]   ;;  %v3449_v20 = vld [vmem:[%s3983_s1 + $0x68] ss:$16 sps:$4 sm:$0xff]   ;;  %v3455_v21 = vld [vmem:[%s3983_s1 + $0x8c] ss:$16 sps:$4 sm:$0xff]  }
  0x1b   : > { %361 = vmatpush1.bf16.msra.mxu0 %v3361_v5  ;;  %402 = vmatpush1.bf16.msra.mxu1 %v3401_v12  ;;  %v3460_v22 = vld [vmem:[%s3983_s1 + $0xa0] ss:$16 sps:$4 sm:$0xff]   ;;  %v3466_v23 = vld [vmem:[%s3983_s1 + $0xc4] ss:$16 sps:$4 sm:$0xff]   ;;  %v3473_v24 = vld [vmem:[%s3983_s1 + $0x88] ss:$16 sps:$4 sm:$0xff]  }
  0x1c   : > { %362 = vmatprep.subr.bf16.mxu0 %v3367_v6  ;;  %403 = vmatprep.subr.bf16.mxu1 %v3418_v15  ;;  %v3478_v25 = vld [vmem:[%s3983_s1 + $0xc0] ss:$16 sps:$4 sm:$0xff]   ;;  %v3484_v26 = vld [vmem:[%s3983_s1 + $0xac] ss:$16 sps:$4 sm:$0xff]   ;;  %v3489_v27 = vld [vmem:[%s3983_s1 + $0xe4] ss:$16 sps:$4 sm:$0xff]  }
  0x1d   : > { %v3494_v28 = vld [vmem:[%s3983_s1 + $0xa8] ss:$16 sps:$4 sm:$0xff]   ;;  %v3500_v29 = vld [vmem:[%s3983_s1 + $0xcc] ss:$16 sps:$4 sm:$0xff]   ;;  %v3507_v30 = vld [vmem:[%s3983_s1 + $0xe0] ss:$16 sps:$4 sm:$0xff]  }
  0x1e   : > { %v157_v31 = vld [vmem:[#allocation2] sm:$0xff]  ;;  %v3513_v32 = vld [vmem:[%s3983_s1 + $0xc8] ss:$16 sps:$4 sm:$0xff]   ;;  %v3519_v33 = vld [vmem:[%s3983_s1 + $0xec] ss:$16 sps:$4 sm:$0xff]  }
  0x1f   : > { %363 = vmatpush1.bf16.msra.mxu0 %v3383_v9  ;;  %404 = vmatpush1.bf16.msra.mxu1 %v3425_v16  ;;  %v165_v34 = vpack.c.bf16 %v157_v31, %v157_v31  ;;  %v3529_v35 = vld [vmem:[%s3983_s1 + $0xe8] ss:$16 sps:$4 sm:$0xff]   ;;  %v159_v36 = vld [vmem:[%s3332_s16] sm:$0xff] }
  0x20   : > { %364 = vmatprep.subr.bf16.mxu0 %v3390_v10  ;;  %405 = vmatprep.subr.bf16.mxu1 %v3431_v17  ;;  %v161_v37 = vunpack.c.l.bf16 %v159_v36  ;;  %v162_v38 = vunpack.c.h.bf16 %v159_v36  ;;  %v158_v63 = vld [vmem:[#allocation3] sm:$0xff] }
  0x23   : > { %365 = vmatpush1.bf16.msra.mxu0 %v3408_v13  ;;  %406 = vmatpush1.bf16.msra.mxu1 %v3449_v20 }
  0x24   : > { %366 = vmatprep.subr.bf16.mxu0 %v3413_v14  ;;  %407 = vmatprep.subr.bf16.mxu1 %v3455_v21 }
  0x27   : > { %367 = vmatpush1.bf16.msra.mxu0 %v3437_v18  ;;  %408 = vmatpush1.bf16.msra.mxu1 %v3473_v24 }
  0x28   : > { %368 = vmatprep.subr.bf16.mxu0 %v3443_v19  ;;  %409 = vmatprep.subr.bf16.mxu1 %v3484_v26 }
  0x2b   : > { %369 = vmatpush1.bf16.msra.mxu0 %v3460_v22  ;;  %410 = vmatpush1.bf16.msra.mxu1 %v3494_v28 }
  0x2c   : > { %370 = vmatprep.subr.bf16.mxu0 %v3466_v23  ;;  %411 = vmatprep.subr.bf16.mxu1 %v3500_v29 }
  0x2f   : > { %371 = vmatpush1.bf16.msra.mxu0 %v3478_v25  ;;  %412 = vmatpush1.bf16.msra.mxu1 %v3513_v32 }
  0x30   : > { %372 = vmatprep.subr.bf16.mxu0 %v3489_v27  ;;  %413 = vmatprep.subr.bf16.mxu1 %v3519_v33 }
  0x33   : > { %373 = vmatpush1.bf16.msra.mxu0 %v3507_v30  ;;  %414 = vmatpush1.bf16.msra.mxu1 %v3529_v35 }
  0x34   : > { %674 = vmatprep.subr.bf16.mxu0 %v3342_v1  ;;  %715 = vmatprep.subr.bf16.mxu1 %v3372_v7 }
  0x36   : > { %391 = vmatmul.mubr.bf16.vlgmr.msra.gmra.mrb[0].mxu0 %v165_v34  ;;  %432 = vmatmul.mubr.bf16.vlgmr.msra.gmra.mrb[0].mxu1 %v165_v34 }
  0x37   : > { %675 = vmatpush1.bf16.msra.mxu0 %v3347_v2  ;;  %706 = vmatprep.mubr.bf16.mxu0 %v3305_v3 }
  0x38   : > { %676 = vmatprep.subr.bf16.mxu0 %v3355_v4  ;;  %716 = vmatpush1.bf16.msra.mxu1 %v3377_v8 }
  0x39   : > { %717 = vmatprep.subr.bf16.mxu1 %v3396_v11  ;;  %747 = vmatprep.mubr.bf16.mxu1 %v3305_v3 }
  0x3b   : > { %677 = vmatpush1.bf16.msra.mxu0 %v3361_v5 }
  0x3c   : > { %678 = vmatprep.subr.bf16.mxu0 %v3367_v6  ;;  %718 = vmatpush1.bf16.msra.mxu1 %v3401_v12 }
  0x3d   : > { %719 = vmatprep.subr.bf16.mxu1 %v3418_v15 }
  0x3f   : > { %679 = vmatpush1.bf16.msra.mxu0 %v3383_v9 }
  0x40   : > { %680 = vmatprep.subr.bf16.mxu0 %v3390_v10  ;;  %720 = vmatpush1.bf16.msra.mxu1 %v3425_v16 }
  0x41   : > { %721 = vmatprep.subr.bf16.mxu1 %v3431_v17 }
  0x43   : > { %681 = vmatpush1.bf16.msra.mxu0 %v3408_v13 }
  0x44   : > { %682 = vmatprep.subr.bf16.mxu0 %v3413_v14  ;;  %722 = vmatpush1.bf16.msra.mxu1 %v3449_v20 }
  0x45   : > { %723 = vmatprep.subr.bf16.mxu1 %v3455_v21 }
  0x47   : > { %683 = vmatpush1.bf16.msra.mxu0 %v3437_v18 }
  0x48   : > { %684 = vmatprep.subr.bf16.mxu0 %v3443_v19  ;;  %724 = vmatpush1.bf16.msra.mxu1 %v3473_v24 }
  0x49   : > { %725 = vmatprep.subr.bf16.mxu1 %v3484_v26 }
  0x4b   : > { %685 = vmatpush1.bf16.msra.mxu0 %v3460_v22 }
  0x4c   : > { %686 = vmatprep.subr.bf16.mxu0 %v3466_v23  ;;  %726 = vmatpush1.bf16.msra.mxu1 %v3494_v28 }
  0x4d   : > { %727 = vmatprep.subr.bf16.mxu1 %v3500_v29 }
  0x4f   : > { %687 = vmatpush1.bf16.msra.mxu0 %v3478_v25 }
  0x50   : > { %688 = vmatprep.subr.bf16.mxu0 %v3489_v27  ;;  %728 = vmatpush1.bf16.msra.mxu1 %v3513_v32 }
  0x51   : > { %729 = vmatprep.subr.bf16.mxu1 %v3519_v33 }
  0x53   : > { %689 = vmatpush1.bf16.msra.mxu0 %v3507_v30 }
  0x54   : > { %991 = vmatprep.subr.bf16.mxu0 %v3342_v1  ;;  %730 = vmatpush1.bf16.msra.mxu1 %v3529_v35 }
  0x55   : > { %1032 = vmatprep.subr.bf16.mxu1 %v3372_v7 }
 0x109   : > { %v392_v39 = vpop.f32.mrb[0].mxu0  ;;  %v433_v49 = vpop.f32.mrb[0].mxu1 }
 0x10a   : > { %v440_v41 = vadd.f32 %v392_v39, %v161_v37  ;;  %v394_v42 = vpop.f32.mrb[1].mxu0  ;;  %v435_v50 = vpop.f32.mrb[1].mxu1  ;;  %v442_v56 = vadd.f32 %v433_v49, %v163_v53  ;;  %v2794_v49 = vld [vmem:[%s3332_s16 + $0x18] sm:$0xff] }
 0x10b   : > { %v441_v43 = vadd.f32 %v394_v42, %v162_v38  ;;  %v396_v44 = vpop.f32.mrb[2].mxu0  ;;  %v443_v51 = vadd.f32 %v435_v50, %v164_v47  ;;  %v437_v52 = vpop.f32.mrb[2].mxu1 }
 0x10c   : > { %v2790_v45 = vmul.f32 -1.442695, %v440_v41  ;;  %v397_v46 = vpop.f32.mrb[3].mxu0  ;;  %v438_v54 = vpop.f32.mrb[3].mxu1 }
 0x10d   : > { %v2791_v48 = vmul.f32 -1.442695, %v441_v43  ;;  %v2792_v55 = vmul.f32 -1.442695, %v443_v51  ;;  %v2793_v43 = vld [vmem:[%s3332_s16 + $0x10] sm:$0xff] }
 0x10e   : > { %3168 = vpow2.f32 %v2790_v45  ;;  %v477_v44 = vunpack.c.l.bf16 %v2793_v43  ;;  %v478_v45 = vunpack.c.h.bf16 %v2793_v43 }
 0x10f   : > { %3170 = vpow2.f32 %v2791_v48 }
 0x110   : > { %3172 = vpow2.f32 %v2792_v55 }
 0x111   : > { %3174 = vtanh.f32 %v442_v56 }
 0x118   : > { %v3169_v57 = vpop.eup %3168 }
 0x119   : > { %v3171_v58 = vpop.eup %3170  ;;  %v447_v59 = vadd.f32 1.0, %v3169_v57 }
 0x11a   : > { %v453_v60 = vadd.f32 1.0, %v3171_v58  ;;  %v3173_v61 = vpop.eup %3172 }
 0x11b   : > { %3176 = vrcp.f32 %v447_v59  ;;  %v3175_v62 = vpop.eup %3174  ;;  %v460_v31 = vadd.f32 1.0, %v3173_v61  ;;  %v480_v59 = vunpack.c.h.bf16 %v2794_v49 }
 0x11c   : > { %3178 = vrcp.f32 %v453_v60 }
 0x11d   : > { %3180 = vrcp.f32 %v460_v31 }
 0x125   : > { %v3177_v0 = vpop.eup %3176 }
 0x126   : > { %v3179_v34 = vpop.eup %3178  ;;  %v464_v36 = vmul.f32 %v3177_v0, %v3175_v62 }
 0x127   : > { %v463_v37 = vmul.f32 %v3179_v34, %v158_v63  ;;  %v3181_v39 = vpop.eup %3180 }
 0x129   : > { %v3571_v38 = vadd.f32 %v464_v36, %v463_v37 }
 0x12b   : > { %3182 = vtanh.f32 %v3571_v38 }
 0x135   : > { %v3183_v40 = vpop.eup %3182 }
 0x136   : > { %v467_v41 = vmul.f32 %v3183_v40, %v3181_v39 }
 0x138   : > { %v470_v42 = vpack.c.bf16 %v467_v41, %v467_v41 }
 0x13a   : > { %471 = vst [vmem:[%s3337_s19] sm:$0xf] %v470_v42  ;;  %707 = vmatmul.mubr.bf16.vlgmr.msra.gmra.mrb[4].mxu0 %v470_v42  ;;  %748 = vmatmul.mubr.bf16.vlgmr.msra.gmra.mrb[4].mxu1 %v470_v42 }
 0x13b   : > { %992 = vmatpush1.bf16.msra.mxu0 %v3347_v2  ;;  %1033 = vmatpush1.bf16.msra.mxu1 %v3377_v8 }
 0x13c   : > { %993 = vmatprep.subr.bf16.mxu0 %v3355_v4  ;;  %1034 = vmatprep.subr.bf16.mxu1 %v3396_v11 }
 0x13d   : > { %1023 = vmatprep.mubr.bf16.mxu0 %v3305_v3  ;;  %1064 = vmatprep.mubr.bf16.mxu1 %v3305_v3 }
 0x13f   : > { %994 = vmatpush1.bf16.msra.mxu0 %v3361_v5  ;;  %1035 = vmatpush1.bf16.msra.mxu1 %v3401_v12 }
 0x140   : > { %995 = vmatprep.subr.bf16.mxu0 %v3367_v6  ;;  %1036 = vmatprep.subr.bf16.mxu1 %v3418_v15 }
 0x143   : > { %996 = vmatpush1.bf16.msra.mxu0 %v3383_v9  ;;  %1037 = vmatpush1.bf16.msra.mxu1 %v3425_v16 }
 0x144   : > { %997 = vmatprep.subr.bf16.mxu0 %v3390_v10  ;;  %1038 = vmatprep.subr.bf16.mxu1 %v3431_v17 }
 0x147   : > { %998 = vmatpush1.bf16.msra.mxu0 %v3408_v13  ;;  %1039 = vmatpush1.bf16.msra.mxu1 %v3449_v20 }
 0x148   : > { %999 = vmatprep.subr.bf16.mxu0 %v3413_v14  ;;  %1040 = vmatprep.subr.bf16.mxu1 %v3455_v21 }
 0x14b   : > { %1000 = vmatpush1.bf16.msra.mxu0 %v3437_v18  ;;  %1041 = vmatpush1.bf16.msra.mxu1 %v3473_v24 }
 0x14c   : > { %1001 = vmatprep.subr.bf16.mxu0 %v3443_v19  ;;  %1042 = vmatprep.subr.bf16.mxu1 %v3484_v26 }
 0x14f   : > { %1002 = vmatpush1.bf16.msra.mxu0 %v3460_v22  ;;  %1043 = vmatpush1.bf16.msra.mxu1 %v3494_v28 }
 0x150   : > { %1003 = vmatprep.subr.bf16.mxu0 %v3466_v23  ;;  %1044 = vmatprep.subr.bf16.mxu1 %v3500_v29 }
 0x153   : > { %1004 = vmatpush1.bf16.msra.mxu0 %v3478_v25  ;;  %1045 = vmatpush1.bf16.msra.mxu1 %v3513_v32 }
 0x154   : > { %1005 = vmatprep.subr.bf16.mxu0 %v3489_v27  ;;  %1046 = vmatprep.subr.bf16.mxu1 %v3519_v33 }
 0x157   : > { %1006 = vmatpush1.bf16.msra.mxu0 %v3507_v30  ;;  %1047 = vmatpush1.bf16.msra.mxu1 %v3529_v35 }
 0x158   : > { %1308 = vmatprep.subr.bf16.mxu0 %v3342_v1  ;;  %1349 = vmatprep.subr.bf16.mxu1 %v3372_v7  ;;  %v479_v7 = vunpack.c.l.bf16 %v2794_v49 }
 0x20d   : > { %v708_v46 = vpop.f32.mrb[4].mxu0  ;;  %v749_v47 = vpop.f32.mrb[4].mxu1 }
 0x20e   : > { %v756_v48 = vadd.f32 %v708_v46, %v477_v44  ;;  %v710_v50 = vpop.f32.mrb[5].mxu0  ;;  %v751_v51 = vpop.f32.mrb[5].mxu1  ;;  %v758_v61 = vadd.f32 %v749_v47, %v479_v7  ;;  %v3699_v7 = vld [vmem:[%s3983_s1 + $0x28] ss:$16 sps:$4 sm:$0xff]  }
 0x20f   : > { %v757_v52 = vadd.f32 %v710_v50, %v478_v45  ;;  %v712_v53 = vpop.f32.mrb[6].mxu0  ;;  %v753_v54 = vpop.f32.mrb[6].mxu1  ;;  %v759_v1 = vadd.f32 %v751_v51, %v480_v59  ;;  %v3689_v59 = vld [vmem:[%s3983_s1 + $0x2c] ss:$16 sps:$4 sm:$0xff]  }
 0x210   : > { %v2827_v55 = vmul.f32 -1.442695, %v756_v48  ;;  %v713_v56 = vpop.f32.mrb[7].mxu0  ;;  %v754_v57 = vpop.f32.mrb[7].mxu1  ;;  %v3660_v54 = vld [vmem:[%s3983_s1 + $0x4] ss:$16 sps:$4 sm:$0xff]  }
 0x211   : > { %v2828_v58 = vmul.f32 -1.442695, %v757_v52  ;;  %v2829_v60 = vmul.f32 -1.442695, %v759_v1  ;;  %v3670_v56 = vld [vmem:[%s3983_s1] ss:$16 sps:$4 sm:$0xff]  }
 0x212   : > { %3184 = vpow2.f32 %v2827_v55  ;;  %v3665_v55 = vld [vmem:[%s3983_s1 + $0xc] ss:$16 sps:$4 sm:$0xff]   ;;  %v3675_v57 = vld [vmem:[%s3983_s1 + $0x8] ss:$16 sps:$4 sm:$0xff]   ;;  %v3694_v1 = vld [vmem:[%s3983_s1 + $0x20] ss:$16 sps:$4 sm:$0xff]  }
 0x213   : > { %3186 = vpow2.f32 %v2828_v58  ;;  %v3684_v58 = vld [vmem:[%s3983_s1 + $0x24] ss:$16 sps:$4 sm:$0xff]  }
 0x214   : > { %3188 = vpow2.f32 %v2829_v60  ;;  %v3708_v60 = vld [vmem:[%s3983_s1 + $0x44] ss:$16 sps:$4 sm:$0xff]  }
 0x215   : > { %3190 = vtanh.f32 %v758_v61  ;;  %v3713_v61 = vld [vmem:[%s3983_s1 + $0x4c] ss:$16 sps:$4 sm:$0xff]  }
 0x21c   : > { %v3185_v62 = vpop.eup %3184 }
 0x21d   : > { %v3187_v63 = vpop.eup %3186  ;;  %v763_v0 = vadd.f32 1.0, %v3185_v62  ;;  %v3718_v62 = vld [vmem:[%s3983_s1 + $0x40] ss:$16 sps:$4 sm:$0xff]  }
 0x21e   : > { %v769_v31 = vadd.f32 1.0, %v3187_v63  ;;  %v3189_v34 = vpop.eup %3188  ;;  %v3723_v63 = vld [vmem:[%s3983_s1 + $0x48] ss:$16 sps:$4 sm:$0xff]  }
 0x21f   : > { %3192 = vrcp.f32 %v763_v0  ;;  %v3191_v36 = vpop.eup %3190  ;;  %v776_v41 = vadd.f32 1.0, %v3189_v34  ;;  %v3732_v0 = vld [vmem:[%s3983_s1 + $0x64] ss:$16 sps:$4 sm:$0xff]   ;;  %v3742_v34 = vld [vmem:[%s3983_s1 + $0x60] ss:$16 sps:$4 sm:$0xff]  }
 0x220   : > { %3194 = vrcp.f32 %v769_v31  ;;  %v3737_v31 = vld [vmem:[%s3983_s1 + $0x6c] ss:$16 sps:$4 sm:$0xff]  }
 0x221   : > { %3196 = vrcp.f32 %v776_v41  ;;  %v3771_v41 = vld [vmem:[%s3983_s1 + $0x88] ss:$16 sps:$4 sm:$0xff]  }
 0x229   : > { %v3193_v37 = vpop.eup %3192 }
 0x22a   : > { %v3195_v39 = vpop.eup %3194  ;;  %v780_v40 = vmul.f32 %v3193_v37, %v3191_v36  ;;  %v3747_v36 = vld [vmem:[%s3983_s1 + $0x68] ss:$16 sps:$4 sm:$0xff]   ;;  %v3756_v37 = vld [vmem:[%s3983_s1 + $0x84] ss:$16 sps:$4 sm:$0xff]  }
 0x22b   : > { %v779_v42 = vmul.f32 %v3195_v39, %v3571_v38  ;;  %v3197_v44 = vpop.eup %3196  ;;  %v3761_v39 = vld [vmem:[%s3983_s1 + $0x8c] ss:$16 sps:$4 sm:$0xff]  }
 0x22d   : > { %v3612_v43 = vadd.f32 %v780_v40, %v779_v42  ;;  %v3766_v40 = vld [vmem:[%s3983_s1 + $0x80] ss:$16 sps:$4 sm:$0xff]   ;;  %v3780_v42 = vld [vmem:[%s3983_s1 + $0xa4] ss:$16 sps:$4 sm:$0xff]  }
 0x22f   : > { %3198 = vtanh.f32 %v3612_v43 }
 0x239   : > { %v3199_v45 = vpop.eup %3198 }
 0x23a   : > { %v783_v46 = vmul.f32 %v3199_v45, %v3197_v44  ;;  %v3790_v44 = vld [vmem:[%s3983_s1 + $0xa0] ss:$16 sps:$4 sm:$0xff]   ;;  %v3795_v45 = vld [vmem:[%s3983_s1 + $0xa8] ss:$16 sps:$4 sm:$0xff]  }
 0x23c   : > { %v786_v47 = vpack.c.bf16 %v783_v46, %v783_v46  ;;  %v3804_v46 = vld [vmem:[%s3983_s1 + $0xc4] ss:$16 sps:$4 sm:$0xff]  }
 0x23e   : > { %2830 = vst [vmem:[%s3337_s19 + $0x4] sm:$0xf] %v786_v47  ;;  %1024 = vmatmul.mubr.bf16.vlgmr.msra.gmra.mrb[8].mxu0 %v786_v47  ;;  %1065 = vmatmul.mubr.bf16.vlgmr.msra.gmra.mrb[8].mxu1 %v786_v47  ;;  %v3809_v47 = vld [vmem:[%s3983_s1 + $0xcc] ss:$16 sps:$4 sm:$0xff]  }
 0x23f   : > { %1309 = vmatpush1.bf16.msra.mxu0 %v3347_v2  ;;  %1350 = vmatpush1.bf16.msra.mxu1 %v3377_v8  ;;  %v2831_v2 = vld [vmem:[%s3332_s16 + $0x20] sm:$0xff] }
 0x240   : > { %1310 = vmatprep.subr.bf16.mxu0 %v3355_v4  ;;  %1351 = vmatprep.subr.bf16.mxu1 %v3396_v11  ;;  %v794_v4 = vunpack.c.l.bf16 %v2831_v2 }
 0x241   : > { %1340 = vmatprep.mubr.bf16.mxu0 %v3305_v3  ;;  %1381 = vmatprep.mubr.bf16.mxu1 %v3305_v3 }
 0x243   : > { %1311 = vmatpush1.bf16.msra.mxu0 %v3361_v5  ;;  %1352 = vmatpush1.bf16.msra.mxu1 %v3401_v12  ;;  %v795_v5 = vunpack.c.h.bf16 %v2831_v2  ;;  %v3814_v2 = vld [vmem:[%s3983_s1 + $0xc0] ss:$16 sps:$4 sm:$0xff]  }
 0x244   : > { %1312 = vmatprep.subr.bf16.mxu0 %v3367_v6  ;;  %1353 = vmatprep.subr.bf16.mxu1 %v3418_v15 }
 0x247   : > { %1313 = vmatpush1.bf16.msra.mxu0 %v3383_v9  ;;  %1354 = vmatpush1.bf16.msra.mxu1 %v3425_v16 }
 0x248   : > { %1314 = vmatprep.subr.bf16.mxu0 %v3390_v10  ;;  %1355 = vmatprep.subr.bf16.mxu1 %v3431_v17  ;;  %v2832_v10 = vld [vmem:[%s3332_s16 + $0x28] sm:$0xff] }
 0x24b   : > { %1315 = vmatpush1.bf16.msra.mxu0 %v3408_v13  ;;  %1356 = vmatpush1.bf16.msra.mxu1 %v3449_v20  ;;  %v797_v20 = vunpack.c.h.bf16 %v2832_v10 }
 0x24c   : > { %1316 = vmatprep.subr.bf16.mxu0 %v3413_v14  ;;  %1357 = vmatprep.subr.bf16.mxu1 %v3455_v21 }
 0x24f   : > { %1317 = vmatpush1.bf16.msra.mxu0 %v3437_v18  ;;  %1358 = vmatpush1.bf16.msra.mxu1 %v3473_v24 }
 0x250   : > { %1318 = vmatprep.subr.bf16.mxu0 %v3443_v19  ;;  %1359 = vmatprep.subr.bf16.mxu1 %v3484_v26 }
 0x253   : > { %1319 = vmatpush1.bf16.msra.mxu0 %v3460_v22  ;;  %1360 = vmatpush1.bf16.msra.mxu1 %v3494_v28  ;;  %v796_v22 = vunpack.c.l.bf16 %v2832_v10  ;;  %v2869_v10 = vld [vmem:[%s3332_s16 + $0x30] sm:$0xff] }
 0x254   : > { %1320 = vmatprep.subr.bf16.mxu0 %v3466_v23  ;;  %1361 = vmatprep.subr.bf16.mxu1 %v3500_v29 }
 0x257   : > { %1321 = vmatpush1.bf16.msra.mxu0 %v3478_v25  ;;  %1362 = vmatpush1.bf16.msra.mxu1 %v3513_v32 }
 0x258   : > { %1322 = vmatprep.subr.bf16.mxu0 %v3489_v27  ;;  %1363 = vmatprep.subr.bf16.mxu1 %v3519_v33 }
 0x25b   : > { %1323 = vmatpush1.bf16.msra.mxu0 %v3507_v30  ;;  %1364 = vmatpush1.bf16.msra.mxu1 %v3529_v35 }
 0x25c   : > { %1625 = vmatprep.subr.bf16.mxu0 %v3660_v54  ;;  %1666 = vmatprep.subr.bf16.mxu1 %v3665_v55 }
 0x311   : > { %v1025_v6 = vpop.f32.mrb[8].mxu0  ;;  %v1066_v8 = vpop.f32.mrb[8].mxu1 }
 0x312   : > { %v1073_v9 = vadd.f32 %v1025_v6, %v794_v4  ;;  %v1027_v11 = vpop.f32.mrb[9].mxu0  ;;  %v1068_v12 = vpop.f32.mrb[9].mxu1  ;;  %v1075_v24 = vadd.f32 %v1066_v8, %v796_v22  ;;  %v3819_v4 = vld [vmem:[%s3983_s1 + $0xc8] ss:$16 sps:$4 sm:$0xff]   ;;  %v3833_v6 = vld [vmem:[%s3983_s1 + $0xec] ss:$16 sps:$4 sm:$0xff]  }
 0x313   : > { %v1074_v13 = vadd.f32 %v1027_v11, %v795_v5  ;;  %v1029_v14 = vpop.f32.mrb[10].mxu0  ;;  %v1070_v15 = vpop.f32.mrb[10].mxu1  ;;  %v1076_v21 = vadd.f32 %v1068_v12, %v797_v20  ;;  %v3828_v5 = vld [vmem:[%s3983_s1 + $0xe4] ss:$16 sps:$4 sm:$0xff]   ;;  %v3838_v8 = vld [vmem:[%s3983_s1 + $0xe0] ss:$16 sps:$4 sm:$0xff]   ;;  %v1111_v11 = vunpack.c.l.bf16 %v2869_v10  ;;  %v1112_v12 = vunpack.c.h.bf16 %v2869_v10 }
 0x314   : > { %v2865_v16 = vmul.f32 -1.442695, %v1073_v9  ;;  %v1030_v17 = vpop.f32.mrb[11].mxu0  ;;  %v1071_v18 = vpop.f32.mrb[11].mxu1  ;;  %v3843_v9 = vld [vmem:[%s3983_s1 + $0xe8] ss:$16 sps:$4 sm:$0xff]  }
 0x315   : > { %v2866_v19 = vmul.f32 -1.442695, %v1074_v13  ;;  %v2867_v23 = vmul.f32 -1.442695, %v1076_v21 }
 0x316   : > { %3200 = vpow2.f32 %v2865_v16  ;;  %v2870_v16 = vld [vmem:[%s3332_s16 + $0x38] sm:$0xff] }
 0x317   : > { %3202 = vpow2.f32 %v2866_v19 }
 0x318   : > { %3204 = vpow2.f32 %v2867_v23 }
 0x319   : > { %3206 = vtanh.f32 %v1075_v24 }
 0x320   : > { %v3201_v25 = vpop.eup %3200 }
 0x321   : > { %v3203_v26 = vpop.eup %3202  ;;  %v1080_v27 = vadd.f32 1.0, %v3201_v25 }
 0x322   : > { %v1086_v28 = vadd.f32 1.0, %v3203_v26  ;;  %v3205_v29 = vpop.eup %3204  ;;  %v1114_v26 = vunpack.c.h.bf16 %v2870_v16 }
 0x323   : > { %3208 = vrcp.f32 %v1080_v27  ;;  %v3207_v30 = vpop.eup %3206  ;;  %v1093_v38 = vadd.f32 1.0, %v3205_v29 }
 0x324   : > { %3210 = vrcp.f32 %v1086_v28  ;;  %v1113_v28 = vunpack.c.l.bf16 %v2870_v16 }
 0x325   : > { %3212 = vrcp.f32 %v1093_v38 }
 0x32d   : > { %v3209_v32 = vpop.eup %3208 }
 0x32e   : > { %v3211_v33 = vpop.eup %3210  ;;  %v1097_v35 = vmul.f32 %v3209_v32, %v3207_v30 }
 0x32f   : > { %v1096_v48 = vmul.f32 %v3211_v33, %v3612_v43  ;;  %v3213_v50 = vpop.eup %3212  ;;  %v3785_v43 = vld [vmem:[%s3983_s1 + $0xac] ss:$16 sps:$4 sm:$0xff]  }
 0x331   : > { %v3651_v49 = vadd.f32 %v1097_v35, %v1096_v48 }
 0x333   : > { %3214 = vtanh.f32 %v3651_v49 }
 0x33d   : > { %v3215_v51 = vpop.eup %3214 }
 0x33e   : > { %v1100_v52 = vmul.f32 %v3215_v51, %v3213_v50 }
 0x340   : > { %v1103_v53 = vpack.c.bf16 %v1100_v52, %v1100_v52 }
 0x342   : > { %2868 = vst [vmem:[%s3337_s19 + $0x8] sm:$0xf] %v1103_v53  ;;  %1341 = vmatmul.mubr.bf16.vlgmr.msra.gmra.mrb[12].mxu0 %v1103_v53  ;;  %1382 = vmatmul.mubr.bf16.vlgmr.msra.gmra.mrb[12].mxu1 %v1103_v53 }
 0x343   : > { %1657 = vmatprep.mubr.bf16.mxu0 %v3305_v3  ;;  %1698 = vmatprep.mubr.bf16.mxu1 %v3305_v3 }
 0x344   : > { %1626 = vmatpush1.bf16.msra.mxu0 %v3670_v56  ;;  %1667 = vmatpush1.bf16.msra.mxu1 %v3675_v57 }
 0x345   : > { %1627 = vmatprep.subr.bf16.mxu0 %v3684_v58  ;;  %1668 = vmatprep.subr.bf16.mxu1 %v3689_v59 }
 0x348   : > { %1628 = vmatpush1.bf16.msra.mxu0 %v3694_v1  ;;  %1669 = vmatpush1.bf16.msra.mxu1 %v3699_v7 }
 0x349   : > { %1629 = vmatprep.subr.bf16.mxu0 %v3708_v60  ;;  %1670 = vmatprep.subr.bf16.mxu1 %v3713_v61 }
 0x34c   : > { %1630 = vmatpush1.bf16.msra.mxu0 %v3718_v62  ;;  %1671 = vmatpush1.bf16.msra.mxu1 %v3723_v63 }
 0x34d   : > { %1631 = vmatprep.subr.bf16.mxu0 %v3732_v0  ;;  %1672 = vmatprep.subr.bf16.mxu1 %v3737_v31 }
 0x350   : > { %1632 = vmatpush1.bf16.msra.mxu0 %v3742_v34  ;;  %1673 = vmatpush1.bf16.msra.mxu1 %v3747_v36 }
 0x351   : > { %1633 = vmatprep.subr.bf16.mxu0 %v3756_v37  ;;  %1674 = vmatprep.subr.bf16.mxu1 %v3761_v39 }
 0x354   : > { %1634 = vmatpush1.bf16.msra.mxu0 %v3766_v40  ;;  %1675 = vmatpush1.bf16.msra.mxu1 %v3771_v41 }
 0x355   : > { %1635 = vmatprep.subr.bf16.mxu0 %v3780_v42  ;;  %1676 = vmatprep.subr.bf16.mxu1 %v3785_v43 }
 0x358   : > { %1636 = vmatpush1.bf16.msra.mxu0 %v3790_v44  ;;  %1677 = vmatpush1.bf16.msra.mxu1 %v3795_v45 }
 0x359   : > { %1637 = vmatprep.subr.bf16.mxu0 %v3804_v46  ;;  %1678 = vmatprep.subr.bf16.mxu1 %v3809_v47 }
 0x35c   : > { %1638 = vmatpush1.bf16.msra.mxu0 %v3814_v2  ;;  %1679 = vmatpush1.bf16.msra.mxu1 %v3819_v4 }
 0x35d   : > { %1639 = vmatprep.subr.bf16.mxu0 %v3828_v5  ;;  %1680 = vmatprep.subr.bf16.mxu1 %v3833_v6 }
 0x360   : > { %1640 = vmatpush1.bf16.msra.mxu0 %v3838_v8  ;;  %1681 = vmatpush1.bf16.msra.mxu1 %v3843_v9 }
 0x361   : > { %1942 = vmatprep.subr.bf16.mxu0 %v3660_v54  ;;  %1983 = vmatprep.subr.bf16.mxu1 %v3665_v55 }
 0x415   : > { %v1342_v13 = vpop.f32.mrb[12].mxu0  ;;  %v1383_v14 = vpop.f32.mrb[12].mxu1 }
 0x416   : > { %v1390_v15 = vadd.f32 %v1342_v13, %v1111_v11  ;;  %v1344_v17 = vpop.f32.mrb[13].mxu0  ;;  %v1385_v18 = vpop.f32.mrb[13].mxu1  ;;  %v1392_v30 = vadd.f32 %v1383_v14, %v1113_v28 }
 0x417   : > { %v1391_v19 = vadd.f32 %v1344_v17, %v1112_v12  ;;  %v1346_v20 = vpop.f32.mrb[14].mxu0  ;;  %v1387_v21 = vpop.f32.mrb[14].mxu1  ;;  %v1393_v27 = vadd.f32 %v1385_v18, %v1114_v26 }
 0x418   : > { %v2903_v22 = vmul.f32 -1.442695, %v1390_v15  ;;  %v1347_v23 = vpop.f32.mrb[15].mxu0  ;;  %v1388_v24 = vpop.f32.mrb[15].mxu1 }
 0x419   : > { %v2904_v25 = vmul.f32 -1.442695, %v1391_v19  ;;  %v2905_v29 = vmul.f32 -1.442695, %v1393_v27 }
 0x41a   : > { %3216 = vpow2.f32 %v2903_v22  ;;  %v2908_v22 = vld [vmem:[%s3332_s16 + $0x48] sm:$0xff] }
 0x41b   : > { %3218 = vpow2.f32 %v2904_v25 }
 0x41c   : > { %3220 = vpow2.f32 %v2905_v29 }
 0x41d   : > { %3222 = vtanh.f32 %v1392_v30 }
 0x424   : > { %v3217_v32 = vpop.eup %3216 }
 0x425   : > { %v3219_v33 = vpop.eup %3218  ;;  %v1397_v35 = vadd.f32 1.0, %v3217_v32 }
 0x426   : > { %v1403_v38 = vadd.f32 1.0, %v3219_v33  ;;  %v3221_v48 = vpop.eup %3220  ;;  %v1431_v33 = vunpack.c.h.bf16 %v2908_v22 }
 0x427   : > { %3224 = vrcp.f32 %v1397_v35  ;;  %v3223_v50 = vpop.eup %3222  ;;  %v1410_v10 = vadd.f32 1.0, %v3221_v48 }
 0x428   : > { %3226 = vrcp.f32 %v1403_v38  ;;  %v1430_v38 = vunpack.c.l.bf16 %v2908_v22 }
 0x429   : > { %3228 = vrcp.f32 %v1410_v10 }
 0x431   : > { %v3225_v51 = vpop.eup %3224 }
 0x432   : > { %v3227_v52 = vpop.eup %3226  ;;  %v1414_v53 = vmul.f32 %v3225_v51, %v3223_v50 }
 0x433   : > { %v1413_v11 = vmul.f32 %v3227_v52, %v3651_v49  ;;  %v3229_v13 = vpop.eup %3228  ;;  %v2907_v49 = vld [vmem:[%s3332_s16 + $0x40] sm:$0xff] }
 0x434   : > { %v1428_v17 = vunpack.c.l.bf16 %v2907_v49  ;;  %v1429_v18 = vunpack.c.h.bf16 %v2907_v49 }
 0x435   : > { %v3854_v12 = vadd.f32 %v1414_v53, %v1413_v11 }
 0x437   : > { %3230 = vtanh.f32 %v3854_v12 }
 0x441   : > { %v3231_v14 = vpop.eup %3230 }
 0x442   : > { %v1417_v15 = vmul.f32 %v3231_v14, %v3229_v13 }
 0x444   : > { %v1420_v16 = vpack.c.bf16 %v1417_v15, %v1417_v15 }
 0x446   : > { %2906 = vst [vmem:[%s3337_s19 + $0xc] sm:$0xf] %v1420_v16  ;;  %1658 = vmatmul.mubr.bf16.vlgmr.msra.gmra.mrb[16].mxu0 %v1420_v16  ;;  %1699 = vmatmul.mubr.bf16.vlgmr.msra.gmra.mrb[16].mxu1 %v1420_v16 }
 0x447   : > { %1943 = vmatpush1.bf16.msra.mxu0 %v3670_v56  ;;  %1984 = vmatpush1.bf16.msra.mxu1 %v3675_v57 }
 0x448   : > { %1944 = vmatprep.subr.bf16.mxu0 %v3684_v58  ;;  %1985 = vmatprep.subr.bf16.mxu1 %v3689_v59 }
 0x449   : > { %1974 = vmatprep.mubr.bf16.mxu0 %v3305_v3  ;;  %2015 = vmatprep.mubr.bf16.mxu1 %v3305_v3 }
 0x44b   : > { %1945 = vmatpush1.bf16.msra.mxu0 %v3694_v1  ;;  %1986 = vmatpush1.bf16.msra.mxu1 %v3699_v7 }
 0x44c   : > { %1946 = vmatprep.subr.bf16.mxu0 %v3708_v60  ;;  %1987 = vmatprep.subr.bf16.mxu1 %v3713_v61 }
 0x44f   : > { %1947 = vmatpush1.bf16.msra.mxu0 %v3718_v62  ;;  %1988 = vmatpush1.bf16.msra.mxu1 %v3723_v63 }
 0x450   : > { %1948 = vmatprep.subr.bf16.mxu0 %v3732_v0  ;;  %1989 = vmatprep.subr.bf16.mxu1 %v3737_v31 }
 0x453   : > { %1949 = vmatpush1.bf16.msra.mxu0 %v3742_v34  ;;  %1990 = vmatpush1.bf16.msra.mxu1 %v3747_v36 }
 0x454   : > { %1950 = vmatprep.subr.bf16.mxu0 %v3756_v37  ;;  %1991 = vmatprep.subr.bf16.mxu1 %v3761_v39 }
 0x457   : > { %1951 = vmatpush1.bf16.msra.mxu0 %v3766_v40  ;;  %1992 = vmatpush1.bf16.msra.mxu1 %v3771_v41 }
 0x458   : > { %1952 = vmatprep.subr.bf16.mxu0 %v3780_v42  ;;  %1993 = vmatprep.subr.bf16.mxu1 %v3785_v43 }
 0x45b   : > { %1953 = vmatpush1.bf16.msra.mxu0 %v3790_v44  ;;  %1994 = vmatpush1.bf16.msra.mxu1 %v3795_v45 }
 0x45c   : > { %1954 = vmatprep.subr.bf16.mxu0 %v3804_v46  ;;  %1995 = vmatprep.subr.bf16.mxu1 %v3809_v47 }
 0x45f   : > { %1955 = vmatpush1.bf16.msra.mxu0 %v3814_v2  ;;  %1996 = vmatpush1.bf16.msra.mxu1 %v3819_v4 }
 0x460   : > { %1956 = vmatprep.subr.bf16.mxu0 %v3828_v5  ;;  %1997 = vmatprep.subr.bf16.mxu1 %v3833_v6 }
 0x463   : > { %1957 = vmatpush1.bf16.msra.mxu0 %v3838_v8  ;;  %1998 = vmatpush1.bf16.msra.mxu1 %v3843_v9 }
 0x464   : > { %2259 = vmatprep.subr.bf16.mxu0 %v3660_v54  ;;  %2300 = vmatprep.subr.bf16.mxu1 %v3665_v55 }
 0x519   : > { %v1659_v19 = vpop.f32.mrb[16].mxu0  ;;  %v1700_v20 = vpop.f32.mrb[16].mxu1 }
 0x51a   : > { %v1707_v21 = vadd.f32 %v1659_v19, %v1428_v17  ;;  %v1661_v23 = vpop.f32.mrb[17].mxu0  ;;  %v1702_v24 = vpop.f32.mrb[17].mxu1  ;;  %v1709_v50 = vadd.f32 %v1700_v20, %v1430_v38 }
 0x51b   : > { %v1708_v25 = vadd.f32 %v1661_v23, %v1429_v18  ;;  %v1663_v26 = vpop.f32.mrb[18].mxu0  ;;  %v1704_v27 = vpop.f32.mrb[18].mxu1  ;;  %v1710_v35 = vadd.f32 %v1702_v24, %v1431_v33 }
 0x51c   : > { %v2941_v28 = vmul.f32 -1.442695, %v1707_v21  ;;  %v1664_v29 = vpop.f32.mrb[19].mxu0  ;;  %v1705_v30 = vpop.f32.mrb[19].mxu1 }
 0x51d   : > { %v2942_v32 = vmul.f32 -1.442695, %v1708_v25  ;;  %v2943_v48 = vmul.f32 -1.442695, %v1710_v35 }
 0x51e   : > { %3232 = vpow2.f32 %v2941_v28  ;;  %v2946_v28 = vld [vmem:[%s3332_s16 + $0x58] sm:$0xff] }
 0x51f   : > { %3234 = vpow2.f32 %v2942_v32 }
 0x520   : > { %3236 = vpow2.f32 %v2943_v48 }
 0x521   : > { %3238 = vtanh.f32 %v1709_v50 }
 0x528   : > { %v3233_v51 = vpop.eup %3232 }
 0x529   : > { %v3235_v52 = vpop.eup %3234  ;;  %v1714_v53 = vadd.f32 1.0, %v3233_v51 }
 0x52a   : > { %v1720_v10 = vadd.f32 1.0, %v3235_v52  ;;  %v3237_v11 = vpop.eup %3236  ;;  %v1748_v52 = vunpack.c.h.bf16 %v2946_v28 }
 0x52b   : > { %3240 = vrcp.f32 %v1714_v53  ;;  %v3239_v13 = vpop.eup %3238  ;;  %v1727_v49 = vadd.f32 1.0, %v3237_v11 }
 0x52c   : > { %3242 = vrcp.f32 %v1720_v10 }
 0x52d   : > { %3244 = vrcp.f32 %v1727_v49 }
 0x535   : > { %v3241_v14 = vpop.eup %3240 }
 0x536   : > { %v3243_v15 = vpop.eup %3242  ;;  %v1731_v16 = vmul.f32 %v3241_v14, %v3239_v13 }
 0x537   : > { %v1730_v17 = vmul.f32 %v3243_v15, %v3854_v12  ;;  %v3245_v19 = vpop.eup %3244  ;;  %v2945_v12 = vld [vmem:[%s3332_s16 + $0x50] sm:$0xff] }
 0x538   : > { %v1745_v23 = vunpack.c.l.bf16 %v2945_v12  ;;  %v1746_v24 = vunpack.c.h.bf16 %v2945_v12 }
 0x539   : > { %v3895_v18 = vadd.f32 %v1731_v16, %v1730_v17 }
 0x53b   : > { %3246 = vtanh.f32 %v3895_v18 }
 0x545   : > { %v3247_v20 = vpop.eup %3246 }
 0x546   : > { %v1734_v21 = vmul.f32 %v3247_v20, %v3245_v19 }
 0x548   : > { %v1737_v22 = vpack.c.bf16 %v1734_v21, %v1734_v21 }
 0x54a   : > { %2944 = vst [vmem:[%s3337_s19 + $0x10] sm:$0xf] %v1737_v22  ;;  %1975 = vmatmul.mubr.bf16.vlgmr.msra.gmra.mrb[20].mxu0 %v1737_v22  ;;  %2016 = vmatmul.mubr.bf16.vlgmr.msra.gmra.mrb[20].mxu1 %v1737_v22 }
 0x54b   : > { %2260 = vmatpush1.bf16.msra.mxu0 %v3670_v56  ;;  %2301 = vmatpush1.bf16.msra.mxu1 %v3675_v57 }
 0x54c   : > { %2261 = vmatprep.subr.bf16.mxu0 %v3684_v58  ;;  %2302 = vmatprep.subr.bf16.mxu1 %v3689_v59 }
 0x54d   : > { %2291 = vmatprep.mubr.bf16.mxu0 %v3305_v3  ;;  %2332 = vmatprep.mubr.bf16.mxu1 %v3305_v3 }
 0x54f   : > { %2262 = vmatpush1.bf16.msra.mxu0 %v3694_v1  ;;  %2303 = vmatpush1.bf16.msra.mxu1 %v3699_v7 }
 0x550   : > { %2263 = vmatprep.subr.bf16.mxu0 %v3708_v60  ;;  %2304 = vmatprep.subr.bf16.mxu1 %v3713_v61 }
 0x553   : > { %2264 = vmatpush1.bf16.msra.mxu0 %v3718_v62  ;;  %2305 = vmatpush1.bf16.msra.mxu1 %v3723_v63 }
 0x554   : > { %2265 = vmatprep.subr.bf16.mxu0 %v3732_v0  ;;  %2306 = vmatprep.subr.bf16.mxu1 %v3737_v31 }
 0x557   : > { %2266 = vmatpush1.bf16.msra.mxu0 %v3742_v34  ;;  %2307 = vmatpush1.bf16.msra.mxu1 %v3747_v36 }
 0x558   : > { %2267 = vmatprep.subr.bf16.mxu0 %v3756_v37  ;;  %2308 = vmatprep.subr.bf16.mxu1 %v3761_v39 }
 0x55b   : > { %2268 = vmatpush1.bf16.msra.mxu0 %v3766_v40  ;;  %2309 = vmatpush1.bf16.msra.mxu1 %v3771_v41 }
 0x55c   : > { %2269 = vmatprep.subr.bf16.mxu0 %v3780_v42  ;;  %2310 = vmatprep.subr.bf16.mxu1 %v3785_v43 }
 0x55f   : > { %2270 = vmatpush1.bf16.msra.mxu0 %v3790_v44  ;;  %2311 = vmatpush1.bf16.msra.mxu1 %v3795_v45 }
 0x560   : > { %2271 = vmatprep.subr.bf16.mxu0 %v3804_v46  ;;  %2312 = vmatprep.subr.bf16.mxu1 %v3809_v47 }
 0x563   : > { %2272 = vmatpush1.bf16.msra.mxu0 %v3814_v2  ;;  %2313 = vmatpush1.bf16.msra.mxu1 %v3819_v4 }
 0x564   : > { %2273 = vmatprep.subr.bf16.mxu0 %v3828_v5  ;;  %2314 = vmatprep.subr.bf16.mxu1 %v3833_v6 }
 0x567   : > { %2274 = vmatpush1.bf16.msra.mxu0 %v3838_v8  ;;  %2315 = vmatpush1.bf16.msra.mxu1 %v3843_v9 }
 0x568   : > { %2576 = vmatprep.subr.bf16.mxu0 %v3660_v54  ;;  %2617 = vmatprep.subr.bf16.mxu1 %v3665_v55  ;;  %v1747_v55 = vunpack.c.l.bf16 %v2946_v28 }
 0x61d   : > { %v1976_v25 = vpop.f32.mrb[20].mxu0  ;;  %v2017_v26 = vpop.f32.mrb[20].mxu1 }
 0x61e   : > { %v2024_v27 = vadd.f32 %v1976_v25, %v1745_v23  ;;  %v1978_v29 = vpop.f32.mrb[21].mxu0  ;;  %v2019_v30 = vpop.f32.mrb[21].mxu1  ;;  %v2026_v10 = vadd.f32 %v2017_v26, %v1747_v55 }
 0x61f   : > { %v2025_v32 = vadd.f32 %v1978_v29, %v1746_v24  ;;  %v1980_v33 = vpop.f32.mrb[22].mxu0  ;;  %v2021_v35 = vpop.f32.mrb[22].mxu1  ;;  %v2027_v54 = vadd.f32 %v2019_v30, %v1748_v52  ;;  %v3022_v52 = vld [vmem:[%s3332_s16 + $0x78] sm:$0xff] }
 0x620   : > { %v2979_v38 = vmul.f32 -1.442695, %v2024_v27  ;;  %v1981_v48 = vpop.f32.mrb[23].mxu0  ;;  %v2022_v50 = vpop.f32.mrb[23].mxu1  ;;  %v3021_v33 = vld [vmem:[%s3332_s16 + $0x70] sm:$0xff] }
 0x621   : > { %v2980_v51 = vmul.f32 -1.442695, %v2025_v32  ;;  %v2981_v53 = vmul.f32 -1.442695, %v2027_v54  ;;  %v2379_v35 = vunpack.c.l.bf16 %v3021_v33 }
 0x622   : > { %3248 = vpow2.f32 %v2979_v38  ;;  %v2380_v38 = vunpack.c.h.bf16 %v3021_v33 }
 0x623   : > { %3250 = vpow2.f32 %v2980_v51 }
 0x624   : > { %3252 = vpow2.f32 %v2981_v53 }
 0x625   : > { %3254 = vtanh.f32 %v2026_v10 }
 0x62c   : > { %v3249_v11 = vpop.eup %3248 }
 0x62d   : > { %v3251_v13 = vpop.eup %3250  ;;  %v2031_v14 = vadd.f32 1.0, %v3249_v11 }
 0x62e   : > { %v2037_v15 = vadd.f32 1.0, %v3251_v13  ;;  %v3253_v16 = vpop.eup %3252 }
 0x62f   : > { %3256 = vrcp.f32 %v2031_v14  ;;  %v3255_v49 = vpop.eup %3254  ;;  %v2044_v21 = vadd.f32 1.0, %v3253_v16 }
 0x630   : > { %3258 = vrcp.f32 %v2037_v15 }
 0x631   : > { %3260 = vrcp.f32 %v2044_v21 }
 0x639   : > { %v3257_v17 = vpop.eup %3256 }
 0x63a   : > { %v3259_v19 = vpop.eup %3258  ;;  %v2048_v20 = vmul.f32 %v3257_v17, %v3255_v49  ;;  %v2382_v49 = vunpack.c.h.bf16 %v3022_v52 }
 0x63b   : > { %v2047_v22 = vmul.f32 %v3259_v19, %v3895_v18  ;;  %v3261_v23 = vpop.eup %3260  ;;  %v2381_v19 = vunpack.c.l.bf16 %v3022_v52 }
 0x63d   : > { %v3936_v12 = vadd.f32 %v2048_v20, %v2047_v22 }
 0x63f   : > { %3262 = vtanh.f32 %v3936_v12 }
 0x649   : > { %v3263_v24 = vpop.eup %3262 }
 0x64a   : > { %v2051_v25 = vmul.f32 %v3263_v24, %v3261_v23 }
 0x64c   : > { %v2054_v26 = vpack.c.bf16 %v2051_v25, %v2051_v25 }
 0x64e   : > { %2982 = vst [vmem:[%s3337_s19 + $0x14] sm:$0xf] %v2054_v26  ;;  %2292 = vmatmul.mubr.bf16.vlgmr.msra.gmra.mrb[24].mxu0 %v2054_v26  ;;  %2333 = vmatmul.mubr.bf16.vlgmr.msra.gmra.mrb[24].mxu1 %v2054_v26 }
 0x64f   : > { %2577 = vmatpush1.bf16.msra.mxu0 %v3670_v56  ;;  %2618 = vmatpush1.bf16.msra.mxu1 %v3675_v57 }
 0x650   : > { %2578 = vmatprep.subr.bf16.mxu0 %v3684_v58  ;;  %2619 = vmatprep.subr.bf16.mxu1 %v3689_v59 }
 0x651   : > { %2608 = vmatprep.mubr.bf16.mxu0 %v3305_v3  ;;  %2649 = vmatprep.mubr.bf16.mxu1 %v3305_v3  ;;  %v2983_v3 = vld [vmem:[%s3332_s16 + $0x60] sm:$0xff] }
 0x652   : > { %v2062_v56 = vunpack.c.l.bf16 %v2983_v3  ;;  %v2063_v57 = vunpack.c.h.bf16 %v2983_v3 }
 0x653   : > { %2579 = vmatpush1.bf16.msra.mxu0 %v3694_v1  ;;  %2620 = vmatpush1.bf16.msra.mxu1 %v3699_v7  ;;  %v2984_v7 = vld [vmem:[%s3332_s16 + $0x68] sm:$0xff] }
 0x654   : > { %2580 = vmatprep.subr.bf16.mxu0 %v3708_v60  ;;  %2621 = vmatprep.subr.bf16.mxu1 %v3713_v61 }
 0x657   : > { %2581 = vmatpush1.bf16.msra.mxu0 %v3718_v62  ;;  %2622 = vmatpush1.bf16.msra.mxu1 %v3723_v63 }
 0x658   : > { %2582 = vmatprep.subr.bf16.mxu0 %v3732_v0  ;;  %2623 = vmatprep.subr.bf16.mxu1 %v3737_v31 }
 0x65b   : > { %2583 = vmatpush1.bf16.msra.mxu0 %v3742_v34  ;;  %2624 = vmatpush1.bf16.msra.mxu1 %v3747_v36 }
 0x65c   : > { %2584 = vmatprep.subr.bf16.mxu0 %v3756_v37  ;;  %2625 = vmatprep.subr.bf16.mxu1 %v3761_v39  ;;  %v2065_v39 = vunpack.c.h.bf16 %v2984_v7 }
 0x65f   : > { %2585 = vmatpush1.bf16.msra.mxu0 %v3766_v40  ;;  %2626 = vmatpush1.bf16.msra.mxu1 %v3771_v41  ;;  %v2064_v41 = vunpack.c.l.bf16 %v2984_v7 }
 0x660   : > { %2586 = vmatprep.subr.bf16.mxu0 %v3780_v42  ;;  %2627 = vmatprep.subr.bf16.mxu1 %v3785_v43 }
 0x663   : > { %2587 = vmatpush1.bf16.msra.mxu0 %v3790_v44  ;;  %2628 = vmatpush1.bf16.msra.mxu1 %v3795_v45 }
 0x664   : > { %2588 = vmatprep.subr.bf16.mxu0 %v3804_v46  ;;  %2629 = vmatprep.subr.bf16.mxu1 %v3809_v47 }
 0x667   : > { %2589 = vmatpush1.bf16.msra.mxu0 %v3814_v2  ;;  %2630 = vmatpush1.bf16.msra.mxu1 %v3819_v4 }
 0x668   : > { %2590 = vmatprep.subr.bf16.mxu0 %v3828_v5  ;;  %2631 = vmatprep.subr.bf16.mxu1 %v3833_v6 }
 0x66b   : > { %2591 = vmatpush1.bf16.msra.mxu0 %v3838_v8  ;;  %2632 = vmatpush1.bf16.msra.mxu1 %v3843_v9 }
 0x721   : > { %v2293_v58 = vpop.f32.mrb[24].mxu0  ;;  %v2334_v59 = vpop.f32.mrb[24].mxu1 }
 0x722   : > { %v2341_v1 = vadd.f32 %v2293_v58, %v2062_v56  ;;  %v2295_v60 = vpop.f32.mrb[25].mxu0  ;;  %v2336_v61 = vpop.f32.mrb[25].mxu1  ;;  %v2343_v43 = vadd.f32 %v2334_v59, %v2064_v41 }
 0x723   : > { %v2342_v62 = vadd.f32 %v2295_v60, %v2063_v57  ;;  %v2297_v63 = vpop.f32.mrb[26].mxu0  ;;  %v2338_v0 = vpop.f32.mrb[26].mxu1  ;;  %v2344_v40 = vadd.f32 %v2336_v61, %v2065_v39 }
 0x724   : > { %v3017_v31 = vmul.f32 -1.442695, %v2341_v1  ;;  %v2298_v34 = vpop.f32.mrb[27].mxu0  ;;  %v2339_v36 = vpop.f32.mrb[27].mxu1 }
 0x725   : > { %v3018_v37 = vmul.f32 -1.442695, %v2342_v62  ;;  %v3019_v42 = vmul.f32 -1.442695, %v2344_v40 }
 0x726   : > { %3264 = vpow2.f32 %v3017_v31 }
 0x727   : > { %3266 = vpow2.f32 %v3018_v37 }
 0x728   : > { %3268 = vpow2.f32 %v3019_v42 }
 0x729   : > { %3270 = vtanh.f32 %v2343_v43 }
 0x730   : > { %v3265_v44 = vpop.eup %3264 }
 0x731   : > { %v3267_v45 = vpop.eup %3266  ;;  %v2348_v46 = vadd.f32 1.0, %v3265_v44 }
 0x732   : > { %v2354_v47 = vadd.f32 1.0, %v3267_v45  ;;  %v3269_v2 = vpop.eup %3268 }
 0x733   : > { %3272 = vrcp.f32 %v2348_v46  ;;  %v3271_v4 = vpop.eup %3270  ;;  %v2361_v9 = vadd.f32 1.0, %v3269_v2 }
 0x734   : > { %3274 = vrcp.f32 %v2354_v47 }
 0x735   : > { %3276 = vrcp.f32 %v2361_v9 }
 0x73d   : > { %v3273_v5 = vpop.eup %3272 }
 0x73e   : > { %v3275_v6 = vpop.eup %3274  ;;  %v2365_v8 = vmul.f32 %v3273_v5, %v3271_v4 }
 0x73f   : > { %v2364_v18 = vmul.f32 %v3275_v6, %v3936_v12  ;;  %v3277_v28 = vpop.eup %3276 }
 0x741   : > { %v2366_v27 = vadd.f32 %v2365_v8, %v2364_v18 }
 0x743   : > { %3278 = vtanh.f32 %v2366_v27 }
 0x74d   : > { %v3279_v29 = vpop.eup %3278 }
 0x74e   : > { %v2368_v30 = vmul.f32 %v3279_v29, %v3277_v28 }
 0x750   : > { %v2371_v32 = vpack.c.bf16 %v2368_v30, %v2368_v30 }
 0x752   : > { %3020 = vst [vmem:[%s3337_s19 + $0x18] sm:$0xf] %v2371_v32  ;;  %2609 = vmatmul.mubr.bf16.vlgmr.msra.gmra.mrb[28].mxu0 %v2371_v32  ;;  %2650 = vmatmul.mubr.bf16.vlgmr.msra.gmra.mrb[28].mxu1 %v2371_v32 }
 0x825   : > { %v2610_v48 = vpop.f32.mrb[28].mxu0  ;;  %v2651_v50 = vpop.f32.mrb[28].mxu1 }
 0x826   : > { %v2658_v51 = vadd.f32 %v2610_v48, %v2379_v35  ;;  %v2612_v54 = vpop.f32.mrb[29].mxu0  ;;  %v2653_v55 = vpop.f32.mrb[29].mxu1  ;;  %v2660_v21 = vadd.f32 %v2651_v50, %v2381_v19 }
 0x827   : > { %v2659_v53 = vadd.f32 %v2612_v54, %v2380_v38  ;;  %v2614_v10 = vpop.f32.mrb[30].mxu0  ;;  %v2655_v11 = vpop.f32.mrb[30].mxu1  ;;  %v2661_v17 = vadd.f32 %v2653_v55, %v2382_v49 }
 0x828   : > { %v3055_v13 = vmul.f32 -1.442695, %v2658_v51  ;;  %v2615_v14 = vpop.f32.mrb[31].mxu0  ;;  %v2656_v15 = vpop.f32.mrb[31].mxu1 }
 0x829   : > { %v3056_v16 = vmul.f32 -1.442695, %v2659_v53  ;;  %v3057_v20 = vmul.f32 -1.442695, %v2661_v17 }
 0x82a   : > { %3280 = vpow2.f32 %v3055_v13 }
 0x82b   : > { %3282 = vpow2.f32 %v3056_v16 }
 0x82c   : > { %3284 = vpow2.f32 %v3057_v20 }
 0x82d   : > { %3286 = vtanh.f32 %v2660_v21 }
 0x834   : > { %v3281_v22 = vpop.eup %3280 }
 0x835   : > { %v3283_v12 = vpop.eup %3282  ;;  %v2665_v23 = vadd.f32 1.0, %v3281_v22 }
 0x836   : > { %v2671_v24 = vadd.f32 1.0, %v3283_v12  ;;  %v3285_v25 = vpop.eup %3284 }
 0x837   : > { %3288 = vrcp.f32 %v2665_v23  ;;  %v3287_v26 = vpop.eup %3286  ;;  %v2678_v58 = vadd.f32 1.0, %v3285_v25 }
 0x838   : > { %3290 = vrcp.f32 %v2671_v24 }
 0x839   : > { %3292 = vrcp.f32 %v2678_v58 }
 0x841   : > { %v3289_v3 = vpop.eup %3288 }
 0x842   : > { %v3291_v56 = vpop.eup %3290  ;;  %v2682_v57 = vmul.f32 %v3289_v3, %v3287_v26 }
 0x843   : > { %v2681_v59 = vmul.f32 %v3291_v56, %v2366_v27  ;;  %v3293_v7 = vpop.eup %3292 }
 0x845   : > { %v2683_v1 = vadd.f32 %v2682_v57, %v2681_v59 }
 0x847   : > { %3294 = vtanh.f32 %v2683_v1  ;;  %2686 = vst [vmem:[#allocation3] sm:$0xff] %v2683_v1 }
 0x851   : > { %v3295_v60 = vpop.eup %3294 }
 0x852   : > { %v2685_v61 = vmul.f32 %v3295_v60, %v3293_v7 }
 0x854   : > { %2687 = vst [vmem:[#allocation2] sm:$0xff] %v2685_v61  ;;  %v2688_v62 = vpack.c.bf16 %v2685_v61, %v2685_v61 }
 0x856   : > { %3058 = vst [vmem:[%s3337_s19 + $0x1c] sm:$0xf] %v2688_v62 }
 0x857 PF: > { %s12_s9 = sadd.s32 1, %s3302_s9  }
 0x858   : > { %p9_p5 = scmp.ge.s32.totalorder %s12_s9, 4  }
 0x85a   :  { %11 = sbr.rel (!%p9_p5) target bundleno = 1 (0x1), region = 76 }

</bundles_post_ra>
